<compile_context>
chip_gen: v7x
topology: tpu7x:2x2x1
jax: 0.10.0
libtpu: 0.0.40
codegen_flags: <defaults>
</compile_context>

<pallas_src>
import functools
import math

import jax
import jax.numpy as jnp
from jax.experimental import pallas as pl
from jax.experimental.pallas import tpu as pltpu


def encoder_layer_kernel(
    x_ref, mask_ref,
    wq_ref, bq_ref, wk_ref, bk_ref, wv_ref, bv_ref,
    wo_ref, bo_ref, g1_ref, be1_ref,
    w1_ref, b1_ref, w2_ref, b2_ref, g2_ref, be2_ref,
    o_ref,
    *, n_head, head_dim, q_tile,
):
    f32 = jnp.float32
    bf16 = jnp.bfloat16

    H = n_head
    TQ = q_tile

    qi = pl.program_id(1)
    start = qi * TQ
    if TQ % 8 == 0:                         # static hint: sublane-aligned slice
        start = pl.multiple_of(start, 8)

    xkv = x_ref[0]                          # (S, D) f32 -- full sequence (K/V source)
    xq = x_ref[0, pl.ds(start, TQ), :]      # (TQ, D) f32 -- query tile / residual
    masked = mask_ref[0] != 0               # (TQ, S) bool, True == masked

    S, D = xkv.shape

    xq_bf = xq.astype(bf16)
    xkv_bf = xkv.astype(bf16)

    # Head-batched Q/K/V projections (weights pre-split per head on the host).
    xq_b = jnp.broadcast_to(xq_bf[None], (H, TQ, D))
    xkv_b = jnp.broadcast_to(xkv_bf[None], (H, S, D))

    q = jnp.einsum("hqd,hde->hqe", xq_b, wq_ref[...],
                   preferred_element_type=f32) + bq_ref[...]      # (H, TQ, Hd)
    k = jnp.einsum("hkd,hde->hke", xkv_b, wk_ref[...],
                   preferred_element_type=f32) + bk_ref[...]      # (H, S, Hd)
    v = jnp.einsum("hkd,hde->hke", xkv_b, wv_ref[...],
                   preferred_element_type=f32) + bv_ref[...]      # (H, S, Hd)

    # Fold 1/(sqrt(dk)+eps) into q: H*TQ*Hd multiplies instead of H*TQ*S.
    inv_scale = 1.0 / (math.sqrt(head_dim) + 1e-8)
    q = q * inv_scale

    # Scaled dot-product attention, f32 softmax statistics.
    score = jnp.einsum("hqe,hke->hqk", q.astype(bf16), k.astype(bf16),
                       preferred_element_type=f32)                # (H, TQ, S)
    score = jnp.where(masked[None, :, :], -jnp.inf, score)
    m = jnp.max(score, axis=-1, keepdims=True)
    p = jnp.exp(score - m)
    p = p * pl.reciprocal(jnp.sum(p, axis=-1, keepdims=True), approx=True)

    ctx = jnp.einsum("hqk,hke->hqe", p.astype(bf16), v.astype(bf16),
                     preferred_element_type=f32)                  # (H, TQ, Hd)

    # Output projection folded per head: concat_h(ctx_h) @ Wo == sum_h ctx_h @ Wo_h.
    o_h = jnp.einsum("hqe,hed->hqd", ctx.astype(bf16), wo_ref[...],
                     preferred_element_type=f32)                  # (H, TQ, D)
    o = jnp.sum(o_h, axis=0) + bo_ref[0]                          # (TQ, D)

    # Residual + LayerNorm 1 (eps=1e-5, biased variance), rsqrt on the EUP.
    h1 = xq + o
    mu1 = jnp.mean(h1, axis=-1, keepdims=True)
    var1 = jnp.mean((h1 - mu1) ** 2, axis=-1, keepdims=True)
    y = (h1 - mu1) * jax.lax.rsqrt(var1 + 1e-5) * g1_ref[0] + be1_ref[0]

    # Position-wise FFN (bf16 matmuls, f32 accumulation) + residual + LayerNorm 2.
    f = jnp.dot(y.astype(bf16), w1_ref[...], preferred_element_type=f32) + b1_ref[0]
    f = jnp.maximum(f, 0.0)
    f2 = jnp.dot(f.astype(bf16), w2_ref[...], preferred_element_type=f32) + b2_ref[0]
    h2 = y + f2
    mu2 = jnp.mean(h2, axis=-1, keepdims=True)
    var2 = jnp.mean((h2 - mu2) ** 2, axis=-1, keepdims=True)
    out = (h2 - mu2) * jax.lax.rsqrt(var2 + 1e-5) * g2_ref[0] + be2_ref[0]

    o_ref[0] = out.astype(o_ref.dtype)


def encoder_layer(x, mask, params, *, n_head, q_tile=128):
    """x: (B, S, D) f32, mask: (B, S, S), nonzero == masked."""
    B, S, D = x.shape
    head_dim = D // n_head
    dff = 4 * D

    # Query tile: multiple of 8 (sublane) or the full sequence.
    tq = min(q_tile, S)
    if S % tq != 0 or (tq != S and tq % 8 != 0):
        tq = S
    n_q = S // tq

    bf16 = jnp.bfloat16
    f32 = jnp.float32

    # Host-side (free) weight re-layout: per-head slabs, bf16 for the MXU.
    def split_in(w):   # (D, H*Hd) -> (H, D, Hd)
        return w.reshape(D, n_head, head_dim).transpose(1, 0, 2).astype(bf16)

    wq_h = split_in(params["wq"])
    wk_h = split_in(params["wk"])
    wv_h = split_in(params["wv"])
    bq_h = params["bq"].reshape(n_head, 1, head_dim).astype(f32)
    bk_h = params["bk"].reshape(n_head, 1, head_dim).astype(f32)
    bv_h = params["bv"].reshape(n_head, 1, head_dim).astype(f32)
    wo_h = params["wo"].reshape(n_head, head_dim, D).astype(bf16)   # (H, Hd, D)
    w1 = params["w1"].astype(bf16)
    w2 = params["w2"].astype(bf16)

    mask_i8 = (mask != 0).astype(jnp.int8)

    def full_spec(shape):
        n = len(shape)
        return pl.BlockSpec(shape, lambda b, qi, n=n: (0,) * n)

    in_specs = [
        pl.BlockSpec((1, S, D), lambda b, qi: (b, 0, 0)),     # x: full seq, once per batch
        pl.BlockSpec((1, tq, S), lambda b, qi: (b, qi, 0)),   # mask (int8, per q-tile)
        full_spec((n_head, D, head_dim)), full_spec((n_head, 1, head_dim)),   # wq, bq
        full_spec((n_head, D, head_dim)), full_spec((n_head, 1, head_dim)),   # wk, bk
        full_spec((n_head, D, head_dim)), full_spec((n_head, 1, head_dim)),   # wv, bv
        full_spec((n_head, head_dim, D)), full_spec((1, D)),                  # wo, bo
        full_spec((1, D)), full_spec((1, D)),                                 # ln1 g, b
        full_spec((D, dff)), full_spec((1, dff)),                             # ffn w1, b1
        full_spec((dff, D)), full_spec((1, D)),                               # ffn w2, b2
        full_spec((1, D)), full_spec((1, D)),                                 # ln2 g, b
    ]

    kernel = functools.partial(encoder_layer_kernel,
                               n_head=n_head, head_dim=head_dim, q_tile=tq)

    return pl.pallas_call(
        kernel,
        out_shape=jax.ShapeDtypeStruct((B, S, D), jnp.float32),
        grid_spec=pltpu.PrefetchScalarGridSpec(
            num_scalar_prefetch=0,
            grid=(B, n_q),
            in_specs=in_specs,
            out_specs=pl.BlockSpec((1, tq, D), lambda b, qi: (b, qi, 0)),
        ),
        compiler_params=pltpu.CompilerParams(
            dimension_semantics=("parallel", "parallel"),
        ),
    )(
        x, mask_i8,
        wq_h, bq_h, wk_h, bk_h, wv_h, bv_h,
        wo_h, params["bo"],
        params["g1"], params["be1"],
        w1, params["b1"], w2, params["b2"],
        params["g2"], params["be2"],
    )


def reference_encoder_layer(x, mask, params, *, n_head):
    """Pure-JAX f32 reference matching the PyTorch forward (eval mode)."""
    B, S, D = x.shape
    Hd = D // n_head

    def ln(h, g, b):
        mu = jnp.mean(h, -1, keepdims=True)
        var = jnp.mean((h - mu) ** 2, -1, keepdims=True)
        return (h - mu) / jnp.sqrt(var + 1e-5) * g + b

    q = x @ params["wq"] + params["bq"][0]
    k = x @ params["wk"] + params["bk"][0]
    v = x @ params["wv"] + params["bv"][0]
    split = lambda t: t.reshape(B, S, n_head, Hd).transpose(0, 2, 1, 3)
    qh, kh, vh = split(q), split(k), split(v)
    score = jnp.einsum("bhqd,bhkd->bhqk", qh, kh) / (jnp.sqrt(jnp.float32(Hd)) + 1e-8)
    score = jnp.where(mask[:, None, :, :] > 0.5, -jnp.inf, score)
    attn = jax.nn.softmax(score, axis=-1)
    ctx = jnp.einsum("bhqk,bhkd->bhqd", attn, vh).transpose(0, 2, 1, 3).reshape(B, S, D)
    o = ctx @ params["wo"] + params["bo"][0]
    y = ln(x + o, params["g1"][0], params["be1"][0])
    f = jax.nn.relu(y @ params["w1"] + params["b1"][0])
    f2 = f @ params["w2"] + params["b2"][0]
    return ln(y + f2, params["g2"][0], params["be2"][0])


if __name__ == "__main__":
    B, S, D, H = 2, 8, 32, 4
    dff = 4 * D

    key = jax.random.PRNGKey(0)
    keys = jax.random.split(key, 16)

    def lin(kw, kb, fan_in, shape_w, shape_b):
        bound = 1.0 / jnp.sqrt(fan_in)
        w = jax.random.uniform(kw, shape_w, jnp.float32, -bound, bound)
        b = jax.random.uniform(kb, shape_b, jnp.float32, -bound, bound)
        return w, b

    wq, bq = lin(keys[0], keys[1], D, (D, D), (1, D))
    wk, bk = lin(keys[2], keys[3], D, (D, D), (1, D))
    wv, bv = lin(keys[4], keys[5], D, (D, D), (1, D))
    wo, bo = lin(keys[6], keys[7], D, (D, D), (1, D))
    w1, b1 = lin(keys[8], keys[9], D, (D, dff), (1, dff))
    w2, b2 = lin(keys[10], keys[11], dff, (dff, D), (1, D))

    params = dict(
        wq=wq, bq=bq, wk=wk, bk=bk, wv=wv, bv=bv, wo=wo, bo=bo,
        g1=jnp.ones((1, D), jnp.float32), be1=jnp.zeros((1, D), jnp.float32),
        w1=w1, b1=b1, w2=w2, b2=b2,
        g2=jnp.ones((1, D), jnp.float32), be2=jnp.zeros((1, D), jnp.float32),
    )

    x = jax.random.normal(keys[12], (B, S, D), jnp.float32)

    # padding mask: batch 1 masks attention to the last 2 key positions
    mask = jnp.zeros((B, S, S), jnp.float32)
    mask = mask.at[1, :, S - 2:].set(1.0)

    out = encoder_layer(x, mask, params, n_head=H)
    out = jax.block_until_ready(out)

    ref = reference_encoder_layer(x, mask, params, n_head=H)
    assert out.shape == (B, S, D)
    # bf16 matmuls + approx reciprocal => relaxed tolerance vs the f32 reference.
    assert jnp.allclose(out, ref, atol=5e-2, rtol=5e-2), "mismatch vs reference"

    print("KERNEL_OK")
</pallas_src>

<mosaic_0001>
module attributes {stable_mosaic.version = 11 : i64} {
  func.func @encoder_layer_kernel(%arg0: i32, %arg1: i32, %arg2: memref<1x8x32xf32, #tpu.memory_space<vmem>>, %arg3: memref<1x8x8xi8, #tpu.memory_space<vmem>>, %arg4: memref<4x32x8xbf16, #tpu.memory_space<vmem>>, %arg5: memref<4x1x8xf32, #tpu.memory_space<vmem>>, %arg6: memref<4x32x8xbf16, #tpu.memory_space<vmem>>, %arg7: memref<4x1x8xf32, #tpu.memory_space<vmem>>, %arg8: memref<4x32x8xbf16, #tpu.memory_space<vmem>>, %arg9: memref<4x1x8xf32, #tpu.memory_space<vmem>>, %arg10: memref<4x8x32xbf16, #tpu.memory_space<vmem>>, %arg11: memref<1x32xf32, #tpu.memory_space<vmem>>, %arg12: memref<1x32xf32, #tpu.memory_space<vmem>>, %arg13: memref<1x32xf32, #tpu.memory_space<vmem>>, %arg14: memref<32x128xbf16, #tpu.memory_space<vmem>>, %arg15: memref<1x128xf32, #tpu.memory_space<vmem>>, %arg16: memref<128x32xbf16, #tpu.memory_space<vmem>>, %arg17: memref<1x32xf32, #tpu.memory_space<vmem>>, %arg18: memref<1x32xf32, #tpu.memory_space<vmem>>, %arg19: memref<1x32xf32, #tpu.memory_space<vmem>>, %arg20: memref<1x8x32xf32, #tpu.memory_space<vmem>>) attributes {dimension_semantics = [#tpu.dimension_semantics<parallel>, #tpu.dimension_semantics<parallel>], iteration_bounds = array<i64: 2, 1>, scalar_prefetch = 0 : i64, scratch_operands = 0 : i64, tpu.core_type = #tpu.core_type<tc>, window_params = [{transform_indices = @transform_0, window_bounds = array<i64: 1, 8, 32>}, {transform_indices = @transform_1, window_bounds = array<i64: 1, 8, 8>}, {pipeline_mode = #tpu.pipeline_mode<synchronous>, transform_indices = @transform_2, window_bounds = array<i64: 4, 32, 8>}, {pipeline_mode = #tpu.pipeline_mode<synchronous>, transform_indices = @transform_3, window_bounds = array<i64: 4, 1, 8>}, {pipeline_mode = #tpu.pipeline_mode<synchronous>, transform_indices = @transform_4, window_bounds = array<i64: 4, 32, 8>}, {pipeline_mode = #tpu.pipeline_mode<synchronous>, transform_indices = @transform_5, window_bounds = array<i64: 4, 1, 8>}, {pipeline_mode = #tpu.pipeline_mode<synchronous>, transform_indices = @transform_6, window_bounds = array<i64: 4, 32, 8>}, {pipeline_mode = #tpu.pipeline_mode<synchronous>, transform_indices = @transform_7, window_bounds = array<i64: 4, 1, 8>}, {pipeline_mode = #tpu.pipeline_mode<synchronous>, transform_indices = @transform_8, window_bounds = array<i64: 4, 8, 32>}, {pipeline_mode = #tpu.pipeline_mode<synchronous>, transform_indices = @transform_9, window_bounds = array<i64: 1, 32>}, {pipeline_mode = #tpu.pipeline_mode<synchronous>, transform_indices = @transform_10, window_bounds = array<i64: 1, 32>}, {pipeline_mode = #tpu.pipeline_mode<synchronous>, transform_indices = @transform_11, window_bounds = array<i64: 1, 32>}, {pipeline_mode = #tpu.pipeline_mode<synchronous>, transform_indices = @transform_12, window_bounds = array<i64: 32, 128>}, {pipeline_mode = #tpu.pipeline_mode<synchronous>, transform_indices = @transform_13, window_bounds = array<i64: 1, 128>}, {pipeline_mode = #tpu.pipeline_mode<synchronous>, transform_indices = @transform_14, window_bounds = array<i64: 128, 32>}, {pipeline_mode = #tpu.pipeline_mode<synchronous>, transform_indices = @transform_15, window_bounds = array<i64: 1, 32>}, {pipeline_mode = #tpu.pipeline_mode<synchronous>, transform_indices = @transform_16, window_bounds = array<i64: 1, 32>}, {pipeline_mode = #tpu.pipeline_mode<synchronous>, transform_indices = @transform_17, window_bounds = array<i64: 1, 32>}, {transform_indices = @transform_18, window_bounds = array<i64: 1, 8, 32>}]} {
    %c8_i32 = arith.constant 8 : i32
    %0 = arith.muli %arg1, %c8_i32 : i32
    %1 = tpu.assume_multiple %0, 8 : i32
    %c0 = arith.constant 0 : index
    %c0_0 = arith.constant 0 : index
    %c0_1 = arith.constant 0 : index
    %2 = vector.load %arg2[%c0, %c0_0, %c0_1] : memref<1x8x32xf32, #tpu.memory_space<vmem>>, vector<1x8x32xf32>
    %3 = vector.shape_cast %2 : vector<1x8x32xf32> to vector<8x32xf32>
    %c0_2 = arith.constant 0 : index
    %4 = arith.index_cast %1 : i32 to index
    %c0_3 = arith.constant 0 : index
    %5 = vector.load %arg2[%c0_2, %4, %c0_3] : memref<1x8x32xf32, #tpu.memory_space<vmem>>, vector<1x8x32xf32>
    %6 = vector.shape_cast %5 : vector<1x8x32xf32> to vector<8x32xf32>
    %c0_4 = arith.constant 0 : index
    %c0_5 = arith.constant 0 : index
    %c0_6 = arith.constant 0 : index
    %7 = vector.load %arg3[%c0_4, %c0_5, %c0_6] : memref<1x8x8xi8, #tpu.memory_space<vmem>>, vector<1x8x8xi8>
    %8 = vector.shape_cast %7 : vector<1x8x8xi8> to vector<8x8xi8>
    %c0_i8 = arith.constant 0 : i8
    %9 = vector.broadcast %c0_i8 : i8 to vector<8x8xi8>
    %10 = arith.cmpi ne, %8, %9 : vector<8x8xi8>
    %11 = arith.truncf %6 : vector<8x32xf32> to vector<8x32xbf16>
    %12 = arith.truncf %3 : vector<8x32xf32> to vector<8x32xbf16>
    %13 = vector.shape_cast %11 : vector<8x32xbf16> to vector<1x8x32xbf16>
    %14 = vector.shape_cast %13 : vector<1x8x32xbf16> to vector<1x8x32xbf16>
    %15 = vector.broadcast %14 : vector<1x8x32xbf16> to vector<4x8x32xbf16>
    %16 = vector.shape_cast %12 : vector<8x32xbf16> to vector<1x8x32xbf16>
    %17 = vector.shape_cast %16 : vector<1x8x32xbf16> to vector<1x8x32xbf16>
    %18 = vector.broadcast %17 : vector<1x8x32xbf16> to vector<4x8x32xbf16>
    %c0_7 = arith.constant 0 : index
    %c0_8 = arith.constant 0 : index
    %c0_9 = arith.constant 0 : index
    %19 = vector.load %arg4[%c0_7, %c0_8, %c0_9] : memref<4x32x8xbf16, #tpu.memory_space<vmem>>, vector<4x32x8xbf16>
    "tpu.trace_start"() <{level = 10 : i32, message = "hqd,hde->hqe"}> : () -> ()
    %cst = arith.constant dense<0.000000e+00> : vector<4x8x8xf32>
    %20 = tpu.matmul %15, %19, %cst {dimension_numbers = #tpu.dot_dimension_numbers<[2], [1], [1], [2], [0, 0, 0, 1, 1, 2], [0], [0]>} : vector<4x8x32xbf16>, vector<4x32x8xbf16>, vector<4x8x8xf32> -> vector<4x8x8xf32>
    "tpu.trace_stop"() : () -> ()
    %c0_10 = arith.constant 0 : index
    %c0_11 = arith.constant 0 : index
    %c0_12 = arith.constant 0 : index
    %21 = vector.load %arg5[%c0_10, %c0_11, %c0_12] : memref<4x1x8xf32, #tpu.memory_space<vmem>>, vector<4x1x8xf32>
    %22 = vector.broadcast %21 : vector<4x1x8xf32> to vector<4x8x8xf32>
    %23 = arith.addf %20, %22 : vector<4x8x8xf32>
    %c0_13 = arith.constant 0 : index
    %c0_14 = arith.constant 0 : index
    %c0_15 = arith.constant 0 : index
    %24 = vector.load %arg6[%c0_13, %c0_14, %c0_15] : memref<4x32x8xbf16, #tpu.memory_space<vmem>>, vector<4x32x8xbf16>
    "tpu.trace_start"() <{level = 10 : i32, message = "hkd,hde->hke"}> : () -> ()
    %cst_16 = arith.constant dense<0.000000e+00> : vector<4x8x8xf32>
    %25 = tpu.matmul %18, %24, %cst_16 {dimension_numbers = #tpu.dot_dimension_numbers<[2], [1], [1], [2], [0, 0, 0, 1, 1, 2], [0], [0]>} : vector<4x8x32xbf16>, vector<4x32x8xbf16>, vector<4x8x8xf32> -> vector<4x8x8xf32>
    "tpu.trace_stop"() : () -> ()
    %c0_17 = arith.constant 0 : index
    %c0_18 = arith.constant 0 : index
    %c0_19 = arith.constant 0 : index
    %26 = vector.load %arg7[%c0_17, %c0_18, %c0_19] : memref<4x1x8xf32, #tpu.memory_space<vmem>>, vector<4x1x8xf32>
    %27 = vector.broadcast %26 : vector<4x1x8xf32> to vector<4x8x8xf32>
    %28 = arith.addf %25, %27 : vector<4x8x8xf32>
    %c0_20 = arith.constant 0 : index
    %c0_21 = arith.constant 0 : index
    %c0_22 = arith.constant 0 : index
    %29 = vector.load %arg8[%c0_20, %c0_21, %c0_22] : memref<4x32x8xbf16, #tpu.memory_space<vmem>>, vector<4x32x8xbf16>
    "tpu.trace_start"() <{level = 10 : i32, message = "hkd,hde->hke"}> : () -> ()
    %cst_23 = arith.constant dense<0.000000e+00> : vector<4x8x8xf32>
    %30 = tpu.matmul %18, %29, %cst_23 {dimension_numbers = #tpu.dot_dimension_numbers<[2], [1], [1], [2], [0, 0, 0, 1, 1, 2], [0], [0]>} : vector<4x8x32xbf16>, vector<4x32x8xbf16>, vector<4x8x8xf32> -> vector<4x8x8xf32>
    "tpu.trace_stop"() : () -> ()
    %c0_24 = arith.constant 0 : index
    %c0_25 = arith.constant 0 : index
    %c0_26 = arith.constant 0 : index
    %31 = vector.load %arg9[%c0_24, %c0_25, %c0_26] : memref<4x1x8xf32, #tpu.memory_space<vmem>>, vector<4x1x8xf32>
    %32 = vector.broadcast %31 : vector<4x1x8xf32> to vector<4x8x8xf32>
    %33 = arith.addf %30, %32 : vector<4x8x8xf32>
    %cst_27 = arith.constant 0.353553385 : f32
    %34 = vector.broadcast %cst_27 : f32 to vector<4x8x8xf32>
    %35 = arith.mulf %23, %34 : vector<4x8x8xf32>
    %36 = arith.truncf %35 : vector<4x8x8xf32> to vector<4x8x8xbf16>
    %37 = arith.truncf %28 : vector<4x8x8xf32> to vector<4x8x8xbf16>
    "tpu.trace_start"() <{level = 10 : i32, message = "hqe,hke->hqk"}> : () -> ()
    %cst_28 = arith.constant dense<0.000000e+00> : vector<4x8x8xf32>
    %38 = tpu.matmul %36, %37, %cst_28 {dimension_numbers = #tpu.dot_dimension_numbers<[2], [2], [1], [1], [0, 0, 0, 1, 1, 1], [0], [0]>} : vector<4x8x8xbf16>, vector<4x8x8xbf16>, vector<4x8x8xf32> -> vector<4x8x8xf32>
    "tpu.trace_stop"() : () -> ()
    %39 = vector.shape_cast %10 : vector<8x8xi1> to vector<1x8x8xi1>
    %cst_29 = arith.constant 0xFF800000 : f32
    %40 = vector.shape_cast %39 : vector<1x8x8xi1> to vector<1x8x8xi1>
    %41 = vector.broadcast %40 : vector<1x8x8xi1> to vector<4x8x8xi1>
    %42 = vector.broadcast %cst_29 : f32 to vector<4x8x8xf32>
    %43 = arith.select %41, %42, %38 : vector<4x8x8xi1>, vector<4x8x8xf32>
    %cst_30 = arith.constant dense<0xFF800000> : vector<4x8xf32>
    %44 = vector.multi_reduction <maximumf>, %43, %cst_30 [2] : vector<4x8x8xf32> to vector<4x8xf32>
    %45 = vector.shape_cast %44 : vector<4x8xf32> to vector<4x8x1xf32>
    %46 = vector.broadcast %45 : vector<4x8x1xf32> to vector<4x8x8xf32>
    %47 = arith.subf %43, %46 : vector<4x8x8xf32>
    %48 = math.exp %47 : vector<4x8x8xf32>
    %cst_31 = arith.constant dense<0.000000e+00> : vector<4x8xf32>
    %49 = vector.multi_reduction <add>, %48, %cst_31 [2] : vector<4x8x8xf32> to vector<4x8xf32>
    %50 = vector.shape_cast %49 : vector<4x8xf32> to vector<4x8x1xf32>
    %51 = tpu.reciprocal %50 {approx = true} : vector<4x8x1xf32> -> vector<4x8x1xf32>
    %52 = vector.broadcast %51 : vector<4x8x1xf32> to vector<4x8x8xf32>
    %53 = arith.mulf %48, %52 : vector<4x8x8xf32>
    %54 = arith.truncf %53 : vector<4x8x8xf32> to vector<4x8x8xbf16>
    %55 = arith.truncf %33 : vector<4x8x8xf32> to vector<4x8x8xbf16>
    "tpu.trace_start"() <{level = 10 : i32, message = "hqk,hke->hqe"}> : () -> ()
    %cst_32 = arith.constant dense<0.000000e+00> : vector<4x8x8xf32>
    %56 = tpu.matmul %54, %55, %cst_32 {dimension_numbers = #tpu.dot_dimension_numbers<[2], [1], [1], [2], [0, 0, 0, 1, 1, 2], [0], [0]>} : vector<4x8x8xbf16>, vector<4x8x8xbf16>, vector<4x8x8xf32> -> vector<4x8x8xf32>
    "tpu.trace_stop"() : () -> ()
    %57 = arith.truncf %56 : vector<4x8x8xf32> to vector<4x8x8xbf16>
    %c0_33 = arith.constant 0 : index
    %c0_34 = arith.constant 0 : index
    %c0_35 = arith.constant 0 : index
    %58 = vector.load %arg10[%c0_33, %c0_34, %c0_35] : memref<4x8x32xbf16, #tpu.memory_space<vmem>>, vector<4x8x32xbf16>
    "tpu.trace_start"() <{level = 10 : i32, message = "hqe,hed->hqd"}> : () -> ()
    %cst_36 = arith.constant dense<0.000000e+00> : vector<4x8x32xf32>
    %59 = tpu.matmul %57, %58, %cst_36 {dimension_numbers = #tpu.dot_dimension_numbers<[2], [1], [1], [2], [0, 0, 0, 1, 1, 2], [0], [0]>} : vector<4x8x8xbf16>, vector<4x8x32xbf16>, vector<4x8x32xf32> -> vector<4x8x32xf32>
    "tpu.trace_stop"() : () -> ()
    %cst_37 = arith.constant dense<0.000000e+00> : vector<8x32xf32>
    %60 = vector.multi_reduction <add>, %59, %cst_37 [0] : vector<4x8x32xf32> to vector<8x32xf32>
    %c0_38 = arith.constant 0 : index
    %c0_39 = arith.constant 0 : index
    %61 = vector.load %arg11[%c0_38, %c0_39] : memref<1x32xf32, #tpu.memory_space<vmem>>, vector<1x32xf32>
    %62 = vector.shape_cast %61 : vector<1x32xf32> to vector<32xf32>
    %63 = vector.shape_cast %62 : vector<32xf32> to vector<1x32xf32>
    %64 = vector.broadcast %63 : vector<1x32xf32> to vector<8x32xf32>
    %65 = arith.addf %60, %64 : vector<8x32xf32>
    %66 = arith.addf %6, %65 : vector<8x32xf32>
    %cst_40 = arith.constant dense<0.000000e+00> : vector<8xf32>
    %67 = vector.multi_reduction <add>, %66, %cst_40 [1] : vector<8x32xf32> to vector<8xf32>
    %68 = vector.shape_cast %67 : vector<8xf32> to vector<8x1xf32>
    %cst_41 = arith.constant 3.200000e+01 : f32
    %69 = vector.broadcast %cst_41 : f32 to vector<8x1xf32>
    %70 = arith.divf %68, %69 : vector<8x1xf32>
    %71 = vector.broadcast %70 : vector<8x1xf32> to vector<8x32xf32>
    %72 = arith.subf %66, %71 : vector<8x32xf32>
    %73 = arith.mulf %72, %72 : vector<8x32xf32>
    %cst_42 = arith.constant dense<0.000000e+00> : vector<8xf32>
    %74 = vector.multi_reduction <add>, %73, %cst_42 [1] : vector<8x32xf32> to vector<8xf32>
    %75 = vector.shape_cast %74 : vector<8xf32> to vector<8x1xf32>
    %cst_43 = arith.constant 3.200000e+01 : f32
    %76 = vector.broadcast %cst_43 : f32 to vector<8x1xf32>
    %77 = arith.divf %75, %76 : vector<8x1xf32>
    %78 = vector.broadcast %70 : vector<8x1xf32> to vector<8x32xf32>
    %79 = arith.subf %66, %78 : vector<8x32xf32>
    %cst_44 = arith.constant 9.99999974E-6 : f32
    %80 = vector.broadcast %cst_44 : f32 to vector<8x1xf32>
    %81 = arith.addf %77, %80 : vector<8x1xf32>
    %82 = math.rsqrt %81 : vector<8x1xf32>
    %83 = vector.broadcast %82 : vector<8x1xf32> to vector<8x32xf32>
    %84 = arith.mulf %79, %83 : vector<8x32xf32>
    %c0_45 = arith.constant 0 : index
    %c0_46 = arith.constant 0 : index
    %85 = vector.load %arg12[%c0_45, %c0_46] : memref<1x32xf32, #tpu.memory_space<vmem>>, vector<1x32xf32>
    %86 = vector.shape_cast %85 : vector<1x32xf32> to vector<32xf32>
    %87 = vector.shape_cast %86 : vector<32xf32> to vector<1x32xf32>
    %88 = vector.broadcast %87 : vector<1x32xf32> to vector<8x32xf32>
    %89 = arith.mulf %84, %88 : vector<8x32xf32>
    %c0_47 = arith.constant 0 : index
    %c0_48 = arith.constant 0 : index
    %90 = vector.load %arg13[%c0_47, %c0_48] : memref<1x32xf32, #tpu.memory_space<vmem>>, vector<1x32xf32>
    %91 = vector.shape_cast %90 : vector<1x32xf32> to vector<32xf32>
    %92 = vector.shape_cast %91 : vector<32xf32> to vector<1x32xf32>
    %93 = vector.broadcast %92 : vector<1x32xf32> to vector<8x32xf32>
    %94 = arith.addf %89, %93 : vector<8x32xf32>
    %95 = arith.truncf %94 : vector<8x32xf32> to vector<8x32xbf16>
    %c0_49 = arith.constant 0 : index
    %c0_50 = arith.constant 0 : index
    %96 = vector.load %arg14[%c0_49, %c0_50] : memref<32x128xbf16, #tpu.memory_space<vmem>>, vector<32x128xbf16>
    %cst_51 = arith.constant dense<0.000000e+00> : vector<8x128xf32>
    %97 = tpu.matmul %95, %96, %cst_51 {dimension_numbers = #tpu.dot_dimension_numbers<[1], [0], [0], [1], [0, 0, 1, 1], [], []>} : vector<8x32xbf16>, vector<32x128xbf16>, vector<8x128xf32> -> vector<8x128xf32>
    %c0_52 = arith.constant 0 : index
    %c0_53 = arith.constant 0 : index
    %98 = vector.load %arg15[%c0_52, %c0_53] : memref<1x128xf32, #tpu.memory_space<vmem>>, vector<1x128xf32>
    %99 = vector.shape_cast %98 : vector<1x128xf32> to vector<128xf32>
    %100 = vector.shape_cast %99 : vector<128xf32> to vector<1x128xf32>
    %101 = vector.broadcast %100 : vector<1x128xf32> to vector<8x128xf32>
    %102 = arith.addf %97, %101 : vector<8x128xf32>
    %cst_54 = arith.constant 0.000000e+00 : f32
    %103 = vector.broadcast %cst_54 : f32 to vector<8x128xf32>
    %104 = arith.maximumf %102, %103 : vector<8x128xf32>
    %105 = arith.truncf %104 : vector<8x128xf32> to vector<8x128xbf16>
    %c0_55 = arith.constant 0 : index
    %c0_56 = arith.constant 0 : index
    %106 = vector.load %arg16[%c0_55, %c0_56] : memref<128x32xbf16, #tpu.memory_space<vmem>>, vector<128x32xbf16>
    %cst_57 = arith.constant dense<0.000000e+00> : vector<8x32xf32>
    %107 = tpu.matmul %105, %106, %cst_57 {dimension_numbers = #tpu.dot_dimension_numbers<[1], [0], [0], [1], [0, 0, 1, 1], [], []>} : vector<8x128xbf16>, vector<128x32xbf16>, vector<8x32xf32> -> vector<8x32xf32>
    %c0_58 = arith.constant 0 : index
    %c0_59 = arith.constant 0 : index
    %108 = vector.load %arg17[%c0_58, %c0_59] : memref<1x32xf32, #tpu.memory_space<vmem>>, vector<1x32xf32>
    %109 = vector.shape_cast %108 : vector<1x32xf32> to vector<32xf32>
    %110 = vector.shape_cast %109 : vector<32xf32> to vector<1x32xf32>
    %111 = vector.broadcast %110 : vector<1x32xf32> to vector<8x32xf32>
    %112 = arith.addf %107, %111 : vector<8x32xf32>
    %113 = arith.addf %94, %112 : vector<8x32xf32>
    %cst_60 = arith.constant dense<0.000000e+00> : vector<8xf32>
    %114 = vector.multi_reduction <add>, %113, %cst_60 [1] : vector<8x32xf32> to vector<8xf32>
    %115 = vector.shape_cast %114 : vector<8xf32> to vector<8x1xf32>
    %cst_61 = arith.constant 3.200000e+01 : f32
    %116 = vector.broadcast %cst_61 : f32 to vector<8x1xf32>
    %117 = arith.divf %115, %116 : vector<8x1xf32>
    %118 = vector.broadcast %117 : vector<8x1xf32> to vector<8x32xf32>
    %119 = arith.subf %113, %118 : vector<8x32xf32>
    %120 = arith.mulf %119, %119 : vector<8x32xf32>
    %cst_62 = arith.constant dense<0.000000e+00> : vector<8xf32>
    %121 = vector.multi_reduction <add>, %120, %cst_62 [1] : vector<8x32xf32> to vector<8xf32>
    %122 = vector.shape_cast %121 : vector<8xf32> to vector<8x1xf32>
    %cst_63 = arith.constant 3.200000e+01 : f32
    %123 = vector.broadcast %cst_63 : f32 to vector<8x1xf32>
    %124 = arith.divf %122, %123 : vector<8x1xf32>
    %125 = vector.broadcast %117 : vector<8x1xf32> to vector<8x32xf32>
    %126 = arith.subf %113, %125 : vector<8x32xf32>
    %cst_64 = arith.constant 9.99999974E-6 : f32
    %127 = vector.broadcast %cst_64 : f32 to vector<8x1xf32>
    %128 = arith.addf %124, %127 : vector<8x1xf32>
    %129 = math.rsqrt %128 : vector<8x1xf32>
    %130 = vector.broadcast %129 : vector<8x1xf32> to vector<8x32xf32>
    %131 = arith.mulf %126, %130 : vector<8x32xf32>
    %c0_65 = arith.constant 0 : index
    %c0_66 = arith.constant 0 : index
    %132 = vector.load %arg18[%c0_65, %c0_66] : memref<1x32xf32, #tpu.memory_space<vmem>>, vector<1x32xf32>
    %133 = vector.shape_cast %132 : vector<1x32xf32> to vector<32xf32>
    %134 = vector.shape_cast %133 : vector<32xf32> to vector<1x32xf32>
    %135 = vector.broadcast %134 : vector<1x32xf32> to vector<8x32xf32>
    %136 = arith.mulf %131, %135 : vector<8x32xf32>
    %c0_67 = arith.constant 0 : index
    %c0_68 = arith.constant 0 : index
    %137 = vector.load %arg19[%c0_67, %c0_68] : memref<1x32xf32, #tpu.memory_space<vmem>>, vector<1x32xf32>
    %138 = vector.shape_cast %137 : vector<1x32xf32> to vector<32xf32>
    %139 = vector.shape_cast %138 : vector<32xf32> to vector<1x32xf32>
    %140 = vector.broadcast %139 : vector<1x32xf32> to vector<8x32xf32>
    %141 = arith.addf %136, %140 : vector<8x32xf32>
    %c0_69 = arith.constant 0 : index
    %c0_70 = arith.constant 0 : index
    %c0_71 = arith.constant 0 : index
    %142 = vector.load %arg20[%c0_69, %c0_70, %c0_71] : memref<1x8x32xf32, #tpu.memory_space<vmem>>, vector<1x8x32xf32>
    %143 = vector.shape_cast %142 : vector<1x8x32xf32> to vector<8x32xf32>
    %144 = vector.shape_cast %141 : vector<8x32xf32> to vector<1x8x32xf32>
    tpu.vector_store %arg20[%c0_69, %c0_70, %c0_71], %144 {strides = array<i32>} : memref<1x8x32xf32, #tpu.memory_space<vmem>>, vector<1x8x32xf32>,
    return
  }
  func.func @transform_0(%arg0: i32, %arg1: i32) -> (i32, i32, i32) {
    %c0_i32 = arith.constant 0 : i32
    %c0_i32_0 = arith.constant 0 : i32
    %c0_i32_1 = arith.constant 0 : i32
    return %arg0, %c0_i32, %c0_i32_0 : i32, i32, i32
  }
  func.func @transform_1(%arg0: i32, %arg1: i32) -> (i32, i32, i32) {
    %c0_i32 = arith.constant 0 : i32
    %c0_i32_0 = arith.constant 0 : i32
    return %arg0, %arg1, %c0_i32 : i32, i32, i32
  }
  func.func @transform_2(%arg0: i32, %arg1: i32) -> (i32, i32, i32) {
    %c0_i32 = arith.constant 0 : i32
    %c0_i32_0 = arith.constant 0 : i32
    %c0_i32_1 = arith.constant 0 : i32
    %c0_i32_2 = arith.constant 0 : i32
    return %c0_i32, %c0_i32_0, %c0_i32_1 : i32, i32, i32
  }
  func.func @transform_3(%arg0: i32, %arg1: i32) -> (i32, i32, i32) {
    %c0_i32 = arith.constant 0 : i32
    %c0_i32_0 = arith.constant 0 : i32
    %c0_i32_1 = arith.constant 0 : i32
    %c0_i32_2 = arith.constant 0 : i32
    return %c0_i32, %c0_i32_0, %c0_i32_1 : i32, i32, i32
  }
  func.func @transform_4(%arg0: i32, %arg1: i32) -> (i32, i32, i32) {
    %c0_i32 = arith.constant 0 : i32
    %c0_i32_0 = arith.constant 0 : i32
    %c0_i32_1 = arith.constant 0 : i32
    %c0_i32_2 = arith.constant 0 : i32
    return %c0_i32, %c0_i32_0, %c0_i32_1 : i32, i32, i32
  }
  func.func @transform_5(%arg0: i32, %arg1: i32) -> (i32, i32, i32) {
    %c0_i32 = arith.constant 0 : i32
    %c0_i32_0 = arith.constant 0 : i32
    %c0_i32_1 = arith.constant 0 : i32
    %c0_i32_2 = arith.constant 0 : i32
    return %c0_i32, %c0_i32_0, %c0_i32_1 : i32, i32, i32
  }
  func.func @transform_6(%arg0: i32, %arg1: i32) -> (i32, i32, i32) {
    %c0_i32 = arith.constant 0 : i32
    %c0_i32_0 = arith.constant 0 : i32
    %c0_i32_1 = arith.constant 0 : i32
    %c0_i32_2 = arith.constant 0 : i32
    return %c0_i32, %c0_i32_0, %c0_i32_1 : i32, i32, i32
  }
  func.func @transform_7(%arg0: i32, %arg1: i32) -> (i32, i32, i32) {
    %c0_i32 = arith.constant 0 : i32
    %c0_i32_0 = arith.constant 0 : i32
    %c0_i32_1 = arith.constant 0 : i32
    %c0_i32_2 = arith.constant 0 : i32
    return %c0_i32, %c0_i32_0, %c0_i32_1 : i32, i32, i32
  }
  func.func @transform_8(%arg0: i32, %arg1: i32) -> (i32, i32, i32) {
    %c0_i32 = arith.constant 0 : i32
    %c0_i32_0 = arith.constant 0 : i32
    %c0_i32_1 = arith.constant 0 : i32
    %c0_i32_2 = arith.constant 0 : i32
    return %c0_i32, %c0_i32_0, %c0_i32_1 : i32, i32, i32
  }
  func.func @transform_9(%arg0: i32, %arg1: i32) -> (i32, i32) {
    %c0_i32 = arith.constant 0 : i32
    %c0_i32_0 = arith.constant 0 : i32
    %c0_i32_1 = arith.constant 0 : i32
    return %c0_i32, %c0_i32_0 : i32, i32
  }
  func.func @transform_10(%arg0: i32, %arg1: i32) -> (i32, i32) {
    %c0_i32 = arith.constant 0 : i32
    %c0_i32_0 = arith.constant 0 : i32
    %c0_i32_1 = arith.constant 0 : i32
    return %c0_i32, %c0_i32_0 : i32, i32
  }
  func.func @transform_11(%arg0: i32, %arg1: i32) -> (i32, i32) {
    %c0_i32 = arith.constant 0 : i32
    %c0_i32_0 = arith.constant 0 : i32
    %c0_i32_1 = arith.constant 0 : i32
    return %c0_i32, %c0_i32_0 : i32, i32
  }
  func.func @transform_12(%arg0: i32, %arg1: i32) -> (i32, i32) {
    %c0_i32 = arith.constant 0 : i32
    %c0_i32_0 = arith.constant 0 : i32
    %c0_i32_1 = arith.constant 0 : i32
    return %c0_i32, %c0_i32_0 : i32, i32
  }
  func.func @transform_13(%arg0: i32, %arg1: i32) -> (i32, i32) {
    %c0_i32 = arith.constant 0 : i32
    %c0_i32_0 = arith.constant 0 : i32
    %c0_i32_1 = arith.constant 0 : i32
    return %c0_i32, %c0_i32_0 : i32, i32
  }
  func.func @transform_14(%arg0: i32, %arg1: i32) -> (i32, i32) {
    %c0_i32 = arith.constant 0 : i32
    %c0_i32_0 = arith.constant 0 : i32
    %c0_i32_1 = arith.constant 0 : i32
    return %c0_i32, %c0_i32_0 : i32, i32
  }
  func.func @transform_15(%arg0: i32, %arg1: i32) -> (i32, i32) {
    %c0_i32 = arith.constant 0 : i32
    %c0_i32_0 = arith.constant 0 : i32
    %c0_i32_1 = arith.constant 0 : i32
    return %c0_i32, %c0_i32_0 : i32, i32
  }
  func.func @transform_16(%arg0: i32, %arg1: i32) -> (i32, i32) {
    %c0_i32 = arith.constant 0 : i32
    %c0_i32_0 = arith.constant 0 : i32
    %c0_i32_1 = arith.constant 0 : i32
    return %c0_i32, %c0_i32_0 : i32, i32
  }
  func.func @transform_17(%arg0: i32, %arg1: i32) -> (i32, i32) {
    %c0_i32 = arith.constant 0 : i32
    %c0_i32_0 = arith.constant 0 : i32
    %c0_i32_1 = arith.constant 0 : i32
    return %c0_i32, %c0_i32_0 : i32, i32
  }
  func.func @transform_18(%arg0: i32, %arg1: i32) -> (i32, i32, i32) {
    %c0_i32 = arith.constant 0 : i32
    %c0_i32_0 = arith.constant 0 : i32
    return %arg0, %arg1, %c0_i32 : i32, i32, i32
  }
}

</mosaic_0001>

<bundles_post_ra>
// kernel: tpu_custom_call.1
= control target key start
LH: loop header
LB: loop body
LE: loop exit
PB: predicated region body
PF: predicated region fallthrough
CT: control target
= control target key end

     0   :  { %s3507_s0 = inlined_call_operand.vmem [shape: f32[2,8,32], index: 0, kind: input, shape index: {}]   ;;  %s3508_s1 = inlined_call_operand.vmem [shape: s8[2,8,8], index: 1, kind: input, shape index: {}]   ;;  %s3509_s2 = inlined_call_operand.vmem [shape: bf16[4,32,8], index: 2, kind: input, shape index: {}]   ;;  %s3510_s3 = inlined_call_operand.vmem [shape: f32[4,1,8], index: 3, kind: input, shape index: {}]   ;;  %s3511_s4 = inlined_call_operand.vmem [shape: bf16[4,32,8], index: 4, kind: input, shape index: {}]   ;;  %s3512_s5 = inlined_call_operand.vmem [shape: f32[4,1,8], index: 5, kind: input, shape index: {}]   ;;  %s3513_s6 = inlined_call_operand.vmem [shape: bf16[4,32,8], index: 6, kind: input, shape index: {}]   ;;  %s3514_s7 = inlined_call_operand.vmem [shape: f32[4,1,8], index: 7, kind: input, shape index: {}]   ;;  %s3515_s8 = inlined_call_operand.vmem [shape: bf16[4,8,32], index: 8, kind: input, shape index: {}]   ;;  %s3516_s9 = inlined_call_operand.vmem [shape: f32[1,32], index: 9, kind: input, shape index: {}]   ;;  %s3517_s10 = inlined_call_operand.vmem [shape: f32[1,32], index: 10, kind: input, shape index: {}]   ;;  %s3518_s11 = inlined_call_operand.vmem [shape: f32[1,32], index: 11, kind: input, shape index: {}]   ;;  %s3519_s12 = inlined_call_operand.vmem [shape: bf16[32,128], index: 12, kind: input, shape index: {}]   ;;  %s3520_s13 = inlined_call_operand.vmem [shape: f32[1,128], index: 13, kind: input, shape index: {}]   ;;  %s3521_s14 = inlined_call_operand.vmem [shape: bf16[128,32], index: 14, kind: input, shape index: {}]   ;;  %s3522_s15 = inlined_call_operand.vmem [shape: f32[1,32], index: 15, kind: input, shape index: {}]   ;;  %s3523_s16 = inlined_call_operand.vmem [shape: f32[1,32], index: 16, kind: input, shape index: {}]   ;;  %s3524_s17 = inlined_call_operand.vmem [shape: f32[1,32], index: 17, kind: input, shape index: {}]   ;;  %s3525_s18 = inlined_call_operand.hbm [shape: f32[2,8,32], index: 18, kind: output, shape index: {}]  }
   0x1   :  { %3532 = sst [smem:[#allocation10_spill]] %s3507_s0 }
   0x2   :  { %3533 = sst [smem:[#allocation11_spill]] %s3508_s1 }
   0x3   :  { %3534 = sst [smem:[#allocation12_spill]] %s3509_s2 }
   0x4   :  { %3535 = sst [smem:[#allocation13_spill]] %s3510_s3 }
   0x5   :  { %3536 = sst [smem:[#allocation14_spill]] %s3511_s4 }
   0x6   :  { %3537 = sst [smem:[#allocation15_spill]] %s3512_s5 }
   0x7   :  { %3538 = sst [smem:[#allocation16_spill]] %s3525_s18 }
   0x8   :  { %23 = vsyncpa [#allocation3], 0 }
   0x9   :  { %25 = vsyncpa [#allocation3 + $0x1], 0  ;;  %s3028_s27 = smov 0   ;;  %s3030_s28 = smov 0  }
   0xa   :  { %s3032_s29 = smov 0   ;;  %s3034_s30 = smov 0  }
   0xb   :  { %s3036_s0 = smov 0   ;;  %s3038_s19 = smov 0  }
   0xc LB: > { %3539 = sst [smem:[#allocation5_spill]] %s2907_s27  ;;  %s2379_s1 = sadd.s32 4294967295, %s2927_s19   ;;  %s2927_s19 = sphi %s3038_s19, %s31_s19   ;;  %s2923_s0 = sphi %s3036_s0, %s3560_s0   ;;  %s2919_s30 = sphi %s3034_s30, %s3559_s30   ;;  %s2915_s29 = sphi %s3032_s29, %s3558_s29   ;;  %s2911_s28 = sphi %s3030_s28, %s3562_s28   ;;  %s2907_s27 = sphi %s3028_s27, %s3561_s27  }
   0xd   : > { %3540 = sst [smem:[#allocation6_spill]] %s2915_s29  ;;  %s2380_s20 = sadd.s32 4294967294, %s2927_s19  }
   0xe   : > { %3541 = sst [smem:[#allocation7_spill]] %s2923_s0  ;;  %s43_s21 = sadd.s32 1, %s2923_s0 }
   0xf   : > { %s442_s22 = sadd.s32 1, %s2915_s29  ;;  %p45_p0 = scmp.ge.s32.totalorder %s43_s21, 2 }
  0x10   : > { %p452_p1 = scmp.ne.s32.totalorder %s2915_s29, %s2911_s28  ;;  %p453_p2 = scmp.eq.s32.totalorder %s2379_s1, 1 }
  0x11   : > { %p458_p3 = scmp.ne.s32.totalorder %s2911_s28, %s2907_s27  ;;  %s3564_s21 = smov (%p45_p0, %s43_s21), 0 }
  0x12   : > { %3542 = sst [smem:[#allocation8_spill]] %s3564_s21  ;;  %p3068_p4 = por %p453_p2, %p452_p1 }
  0x13   : > { %p459_p5 = scmp.eq.s32.totalorder %s2380_s20, 1  ;;  %s437_s23 = ssub.s32 %s2923_s0, %s3564_s21 }
  0x14   : > { %p2383_p6 = scmp.ge.s32.totalorder %s2927_s19, 1  ;;  %p440_p7 = scmp.eq.s32.totalorder %s437_s23, 0 }
  0x15   : > { %p3075_p8 = por %p459_p5, %p458_p3  ;;  %p542_p9 = scmp.lt.s32.totalorder %s2927_s19, 3 }
  0x16   : > { %s3081_s25 = scalar_select %p440_p7, %s2915_s29, %s442_s22  }
  0x17   : > { %p543_p10 = pnand %p2383_p6, %p542_p9 }
  0x18   : > { %3545 = sst [smem:[#allocation9_spill]] %s3081_s25  ;;  %v2929_v1 = vmov (!%p543_p10), 0.0   ;;  %vm2930_vm0 = vmmov (!%p543_p10), 0   ;;  %p602_p11 = scmp.lt.s32.totalorder (!%p543_p10), %s2919_s30, 1  ;;  %vm680_vm1 = vcmask (!%p543_p10), 261120   ;;  %v2811_v16 = vld [vmem:[%s3513_s6 + $0x10] sm:$0xff] (!%p543_p10)  }
  0x19   : > { %546 = sbr.rel (%p543_p10) target bundleno = 2337 (0x921), region = 92  ;;  %s3546_s27 = sld [smem:[#allocation12_spill]] (!%p543_p10)  ;;  %2541 = vmatprep.subr.bf16.mxu0 (!%p543_p10), %v2929_v1  ;;  %2565 = vmatprep.subr.bf16.mxu1 (!%p543_p10), %v2929_v1  ;;  %v2812_v18 = vld [vmem:[%s3513_s6 + $0x18] sm:$0xff] (!%p543_p10)   ;;  %v2813_v21 = vld [vmem:[%s3513_s6 + $0x30] sm:$0xff] (!%p543_p10)   ;;  %v2815_v23 = vld [vmem:[%s3513_s6] sm:$0xff] (!%p543_p10)   ;;  %vm1399_vm2 = vcmask (!%p543_p10), 64512  }
  0x1a   : > { %2545 = vmatprep.mubr.msk.bf16.mxu0 (!%p543_p10), %vm2930_vm0, %v2929_v1  ;;  %2569 = vmatprep.mubr.msk.bf16.mxu1 (!%p543_p10), %vm2930_vm0, %v2929_v1  ;;  %s3548_s25 = sld [smem:[#allocation10_spill]] (!%p543_p10)  ;;  %s3549_s4 = sld [smem:[#allocation14_spill]] (!%p543_p10)  ;;  %v2814_v22 = vld [vmem:[%s3513_s6 + $0x38] sm:$0xff] (!%p543_p10)   ;;  %v2816_v24 = vld [vmem:[%s3513_s6 + $0x8] sm:$0xff] (!%p543_p10)   ;;  %v2817_v25 = vld [vmem:[%s3513_s6 + $0x20] sm:$0xff] (!%p543_p10)   ;;  %vm1648_vm3 = vcmask (!%p543_p10), 1043456  }
  0x1b   : > { %v2818_v26 = vld [vmem:[%s3513_s6 + $0x28] sm:$0xff] (!%p543_p10)   ;;  %s3550_s5 = sld [smem:[#allocation15_spill]] (!%p543_p10)  ;;  %s3551_s3 = sld [smem:[#allocation13_spill]] (!%p543_p10) }
  0x1c   : > { %s3552_s23 = sld [smem:[#allocation11_spill]] (!%p543_p10)  ;;  %s599_s26 = sand.u32 (!%p543_p10), 1, %s2911_s28  }
  0x1d   : > { %s2384_s0 = sshll.u32 (!%p543_p10), %s599_s26, 3 }
  0x1f   : > { %s3547_s18 = smov (!%p543_p10), %s3546_s27  ;;  %v2795_v0 = vld [vmem:[%s3546_s27] sm:$0xff] (!%p543_p10)  }
  0x20   : > { %v2796_v2 = vld [vmem:[%s3547_s18 + $0x30] sm:$0xff]   ;;  %2542 = vmatpush3.bf16.msra.mxu0 %v2795_v0  ;;  %v2797_v3 = vld [vmem:[%s3547_s18 + $0x8] sm:$0xff]   ;;  %v2798_v4 = vld [vmem:[%s3547_s18 + $0x38] sm:$0xff]   ;;  %s3105_s1 = scalar_select %p602_p11, %s2919_s30, 1 }
  0x21   : > { %2566 = vmatpush3.bf16.msra.mxu1 %v2796_v2  ;;  %2543 = vmatprep.subr.bf16.mxu0 %v2929_v1  ;;  %v2799_v5 = vld [vmem:[%s3547_s18 + $0x10] sm:$0xff]   ;;  %v2801_v9 = vld [vmem:[%s3547_s18 + $0x18] sm:$0xff]   ;;  %v2803_v11 = vld [vmem:[%s3547_s18 + $0x20] sm:$0xff]  }
  0x22   : > { %2567 = vmatprep.subr.bf16.mxu1 %v2929_v1  ;;  %s2385_s21 = sshll.u32 %s3105_s1, 3  ;;  %v2800_v6 = vld [vmem:[%s3549_s4 + $0x10] sm:$0xff]   ;;  %v2802_v10 = vld [vmem:[%s3549_s4 + $0x18] sm:$0xff]   ;;  %v2805_v13 = vld [vmem:[%s3547_s18 + $0x28] sm:$0xff]   ;;  %s2386_s29 = sshll.u32 %s3105_s1, 1 }
  0x23   : > { %s605_s27 = scalar_lea.vmem %s3548_s25, %s2385_s21  ;;  %v2804_v12 = vld [vmem:[%s3549_s4 + $0x30] sm:$0xff]   ;;  %v2806_v14 = vld [vmem:[%s3549_s4 + $0x38] sm:$0xff]   ;;  %v2807_v15 = vld [vmem:[%s3549_s4] sm:$0xff]   ;;  %s612_s22 = scalar_lea.vmem %s3552_s23, %s2386_s29 }
  0x24   : > { %2544 = vmatpush3.bf16.msra.mxu0 %v2797_v3  ;;  %v3118_v7 = vld [vmem:[%s605_s27] sm:$0xff]  ;;  %v2808_v17 = vld [vmem:[%s3549_s4 + $0x8] sm:$0xff]   ;;  %s2466_s23 = sshll.u32 %s2919_s30, 7  ;;  %s2280_s25 = scalar_lea.sflag [#allocation3], %s599_s26 }
  0x25   : > { %2568 = vmatpush3.bf16.msra.mxu1 %v2798_v4  ;;  %2549 = vmatprep.subr.bf16.mxu0 %v2929_v1  ;;  %v3123_v8 = vpack.c.bf16 %v3118_v7, %v3118_v7  ;;  %v2809_v19 = vld [vmem:[%s3549_s4 + $0x20] sm:$0xff]   ;;  %v2810_v20 = vld [vmem:[%s3549_s4 + $0x28] sm:$0xff]   ;;  %s3555_s4 = sld [smem:[#allocation16_spill]]  ;;  %s2932_s30 = smov [#allocation2]  }
  0x26   : > { %2581 = vmatprep.subr.bf16.mxu1 %v2929_v1  ;;  %v2404_v35 = vld [vmem:[%s3550_s5 + $0x1] ss:$0 sm:$0xff]  ;;  %v2406_v49 = vld [vmem:[%s3550_s5 + $0x3] ss:$0 sm:$0xff]  ;;  %v2403_v2 = vld [vmem:[%s3550_s5] ss:$0 sm:$0xff] }
  0x27   : > { %2546 = vmatmul.mubr.msk.bf16.vlgmr.msra.gmra.mrb[0].mxu0 %vm680_vm1, %v3123_v8  ;;  %v2388_v36 = vld [vmem:[%s3551_s3 + $0x1] ss:$0 sm:$0xff]  ;;  %v2390_v51 = vld [vmem:[%s3551_s3 + $0x3] ss:$0 sm:$0xff]  ;;  %v2387_v4 = vld [vmem:[%s3551_s3] ss:$0 sm:$0xff] }
  0x28   : > { %2570 = vmatmul.mubr.msk.bf16.vlgmr.msra.gmra.mrb[0].mxu1 %vm680_vm1, %v3123_v8  ;;  %2550 = vmatpush3.bf16.msra.mxu0 %v2799_v5 }
  0x29   : > { %2582 = vmatpush3.bf16.msra.mxu1 %v2800_v6  ;;  %2551 = vmatprep.subr.bf16.mxu0 %v2929_v1  ;;  %v2420_v6 = vld [vmem:[%s3514_s7 + $0x1] ss:$0 sm:$0xff] }
  0x2a   : > { %2583 = vmatprep.subr.bf16.mxu1 %v2929_v1  ;;  %2553 = vmatprep.mubr.msk.bf16.mxu0 %vm2930_vm0, %v2929_v1 }
  0x2b   : > { %2585 = vmatprep.mubr.msk.bf16.mxu1 %vm2930_vm0, %v2929_v1 }
  0x2c   : > { %2552 = vmatpush3.bf16.msra.mxu0 %v2801_v9 }
  0x2d   : > { %2584 = vmatpush3.bf16.msra.mxu1 %v2802_v10  ;;  %2557 = vmatprep.subr.bf16.mxu0 %v2929_v1 }
  0x2e   : > { %2597 = vmatprep.subr.bf16.mxu1 %v2929_v1 }
  0x2f   : > { %2554 = vmatmul.mubr.msk.bf16.vlgmr.msra.gmra.mrb[4].mxu0 %vm680_vm1, %v3123_v8 }
  0x30   : > { %2586 = vmatmul.mubr.msk.bf16.vlgmr.msra.gmra.mrb[4].mxu1 %vm680_vm1, %v3123_v8  ;;  %2558 = vmatpush3.bf16.msra.mxu0 %v2803_v11 }
  0x31   : > { %2598 = vmatpush3.bf16.msra.mxu1 %v2804_v12  ;;  %2559 = vmatprep.subr.bf16.mxu0 %v2929_v1 }
  0x32   : > { %2599 = vmatprep.subr.bf16.mxu1 %v2929_v1  ;;  %2561 = vmatprep.mubr.msk.bf16.mxu0 %vm2930_vm0, %v2929_v1 }
  0x33   : > { %2601 = vmatprep.mubr.msk.bf16.mxu1 %vm2930_vm0, %v2929_v1 }
  0x34   : > { %2560 = vmatpush3.bf16.msra.mxu0 %v2805_v13 }
  0x35   : > { %2600 = vmatpush3.bf16.msra.mxu1 %v2806_v14  ;;  %2573 = vmatprep.subr.bf16.mxu0 %v2929_v1 }
  0x36   : > { %2613 = vmatprep.subr.bf16.mxu1 %v2929_v1 }
  0x37   : > { %2562 = vmatmul.mubr.msk.bf16.vlgmr.msra.gmra.mrb[8].mxu0 %vm680_vm1, %v3123_v8 }
  0x38   : > { %2602 = vmatmul.mubr.msk.bf16.vlgmr.msra.gmra.mrb[8].mxu1 %vm680_vm1, %v3123_v8  ;;  %2574 = vmatpush3.bf16.msra.mxu0 %v2807_v15 }
  0x39   : > { %2577 = vmatprep.mubr.msk.bf16.mxu0 %vm2930_vm0, %v2929_v1  ;;  %2575 = vmatprep.subr.bf16.mxu0 %v2929_v1 }
  0x3a   : > { %2614 = vmatpush3.bf16.msra.mxu1 %v2811_v16  ;;  %2617 = vmatprep.mubr.msk.bf16.mxu1 %vm2930_vm0, %v2929_v1 }
  0x3b   : > { %2615 = vmatprep.subr.bf16.mxu1 %v2929_v1 }
  0x3c   : > { %2576 = vmatpush3.bf16.msra.mxu0 %v2808_v17 }
  0x3d   : > { %2589 = vmatprep.subr.bf16.mxu0 %v2929_v1 }
  0x3e   : > { %2616 = vmatpush3.bf16.msra.mxu1 %v2812_v18 }
  0x3f   : > { %2629 = vmatprep.subr.bf16.mxu1 %v2929_v1  ;;  %2578 = vmatmul.mubr.msk.bf16.vlgmr.msra.gmra.mrb[12].mxu0 %vm680_vm1, %v3123_v8 }
  0x40   : > { %2590 = vmatpush3.bf16.msra.mxu0 %v2809_v19  ;;  %2593 = vmatprep.mubr.msk.bf16.mxu0 %vm2930_vm0, %v2929_v1 }
  0x41   : > { %2591 = vmatprep.subr.bf16.mxu0 %v2929_v1  ;;  %2618 = vmatmul.mubr.msk.bf16.vlgmr.msra.gmra.mrb[12].mxu1 %vm680_vm1, %v3123_v8 }
  0x42   : > { %2633 = vmatprep.mubr.msk.bf16.mxu1 %vm2930_vm0, %v2929_v1  ;;  %2630 = vmatpush3.bf16.msra.mxu1 %v2813_v21 }
  0x43   : > { %2631 = vmatprep.subr.bf16.mxu1 %v2929_v1 }
  0x44   : > { %2592 = vmatpush3.bf16.msra.mxu0 %v2810_v20 }
  0x45   : > { %2605 = vmatprep.subr.bf16.mxu0 %v2929_v1 }
  0x46   : > { %2632 = vmatpush3.bf16.msra.mxu1 %v2814_v22  ;;  %v2405_v22 = vld [vmem:[%s3550_s5 + $0x2] ss:$0 sm:$0xff]  ;;  %s3459_s5 = scalar_lea.hbm %s3555_s4, %s2466_s23 }
  0x47   : > { %2594 = vmatmul.mubr.msk.bf16.vlgmr.msra.gmra.mrb[16].mxu0 %vm680_vm1, %v3123_v8  ;;  %2643 = vmatprep.subr.bf16.mxu1 %v2929_v1 }
  0x48   : > { %2609 = vmatprep.mubr.msk.bf16.mxu0 %vm2930_vm0, %v2929_v1  ;;  %2606 = vmatpush3.bf16.msra.mxu0 %v2815_v23 }
  0x49   : > { %2607 = vmatprep.subr.bf16.mxu0 %v2929_v1  ;;  %2634 = vmatmul.mubr.msk.bf16.vlgmr.msra.gmra.mrb[16].mxu1 %vm680_vm1, %v3123_v8 }
  0x4a   : > { %2645 = vmatprep.mubr.msk.bf16.mxu1 %vm2930_vm0, %v2929_v1 }
  0x4c   : > { %2608 = vmatpush3.bf16.msra.mxu0 %v2816_v24 }
  0x4d   : > { %2621 = vmatprep.subr.bf16.mxu0 %v2929_v1 }
  0x4f   : > { %2610 = vmatmul.mubr.msk.bf16.vlgmr.msra.gmra.mrb[20].mxu0 %vm680_vm1, %v3123_v8 }
  0x50   : > { %2625 = vmatprep.mubr.msk.bf16.mxu0 %vm2930_vm0, %v2929_v1  ;;  %2622 = vmatpush3.bf16.msra.mxu0 %v2817_v25  ;;  %v2389_v25 = vld [vmem:[%s3551_s3 + $0x2] ss:$0 sm:$0xff] }
  0x51   : > { %2623 = vmatprep.subr.bf16.mxu0 %v2929_v1 }
  0x54   : > { %2624 = vmatpush3.bf16.msra.mxu0 %v2818_v26 }
  0x55   : > { %2637 = vmatprep.subr.bf16.mxu0 %v2929_v1 }
  0x57   : > { %2626 = vmatmul.mubr.msk.bf16.vlgmr.msra.gmra.mrb[24].mxu0 %vm680_vm1, %v3123_v8 }
  0x58   : > { %2639 = vmatprep.mubr.msk.bf16.mxu0 %vm2930_vm0, %v2929_v1 }
  0xfa   : > { %v718_v27 = vpop.f32.mrb[0].mxu0 }
  0xfb   : > { %v874_v28 = vpop.f32.mrb[0].mxu1  ;;  %v2547_v29 = vpop.f32.mrb[1].mxu0  ;;  %v719_v12 = vadd.f32 %v2387_v4, %v718_v27 }
  0xfc   : > { %v2571_v30 = vpop.f32.mrb[1].mxu1  ;;  %v721_v31 = vpop.f32.mrb[2].mxu0  ;;  %v875_v59 = vadd.f32 %v2390_v51, %v874_v28 }
  0xfd   : > { %v877_v32 = vpop.f32.mrb[2].mxu1  ;;  %v2548_v33 = vpop.f32.mrb[3].mxu0  ;;  %v1387_v23 = vmul.f32 0.35355338, %v719_v12 }
  0xfe   : > { %v2572_v34 = vpop.f32.mrb[3].mxu1  ;;  %v1390_v3 = vmul.f32 0.35355338, %v875_v59  ;;  %v2931_v59 = vmov 0  }
  0xff   : > { %v1391_v30 = vpack.c.bf16 %v1387_v23, %v1387_v23 }
 0x100   : > { %v1394_v13 = vpack.c.bf16 %v1390_v3, %v1390_v3 }
 0x102   : > { %v770_v37 = vpop.f32.mrb[4].mxu0 }
 0x103   : > { %v1025_v38 = vpop.f32.mrb[4].mxu1  ;;  %v2555_v40 = vpop.f32.mrb[5].mxu0  ;;  %v771_v44 = vadd.f32 %v2388_v36, %v770_v37 }
 0x104   : > { %v1026_v39 = vadd.f32 %v2404_v35, %v1025_v38  ;;  %v2587_v41 = vpop.f32.mrb[5].mxu1  ;;  %v773_v42 = vpop.f32.mrb[6].mxu0 }
 0x105   : > { %v1028_v43 = vpop.f32.mrb[6].mxu1  ;;  %v2556_v46 = vpop.f32.mrb[7].mxu0  ;;  %v1388_v50 = vmul.f32 0.35355338, %v771_v44  ;;  %v2419_v41 = vld [vmem:[%s3514_s7] ss:$0 sm:$0xff] }
 0x106   : > { %v1396_v45 = vpack.c.bf16 %v1026_v39, %v1026_v39  ;;  %v2588_v47 = vpop.f32.mrb[7].mxu1 }
 0x107   : > { %v1392_v60 = vpack.c.bf16 %v1388_v50, %v1388_v50 }
 0x108   : > { %v1450_v48 = vsel %vm1399_vm2, %v1396_v45, 0 }
 0x109   : > { %2644 = vmatpush3.bf16.xpose.msra.mxu1 %v1450_v48 }
 0x10a   : > { %2655 = vmatprep.subr.bf16.mxu1 %v2929_v1  ;;  %v822_v52 = vpop.f32.mrb[8].mxu0 }
 0x10b   : > { %v1129_v53 = vpop.f32.mrb[8].mxu1  ;;  %v2563_v55 = vpop.f32.mrb[9].mxu0  ;;  %v823_v31 = vadd.f32 %v2389_v25, %v822_v52 }
 0x10c   : > { %v1130_v54 = vadd.f32 %v2406_v49, %v1129_v53  ;;  %v2603_v56 = vpop.f32.mrb[9].mxu1  ;;  %v825_v57 = vpop.f32.mrb[10].mxu0 }
 0x10d   : > { %v1132_v58 = vpop.f32.mrb[10].mxu1  ;;  %v2564_v62 = vpop.f32.mrb[11].mxu0  ;;  %v1389_v35 = vmul.f32 0.35355338, %v823_v31  ;;  %v620_v56 = vld [vmem:[%s612_s22] sm:$0x3] }
 0x10e   : > { %v1398_v61 = vpack.c.bf16 %v1130_v54, %v1130_v54  ;;  %v2604_v63 = vpop.f32.mrb[11].mxu1  ;;  %vm621_vm4 = vnez %v620_v56  ;;  %s601_s22 = scalar_lea.vmem [#allocation2], %s2384_s0  ;;  %s2853_s0 = sshll.u32 %s2932_s30, 4  ;;  %s2854_s0 = int_to_ptr.vmem [resolvable:$false] %s2853_s0 }
 0x10f   : > { %v1393_v36 = vpack.c.bf16 %v1389_v35, %v1389_v35  ;;  %s2294_s1 = sshll.u32 %s601_s22, 4  ;;  %s2855_s21 = scalar_lea.vmem %s2854_s0, 256  ;;  %s3461_s1 = int_to_ptr.vmem [resolvable:$true] %s2294_s1 }
 0x110   : > { %v1542_v0 = vsel %vm1399_vm2, %v1398_v61, 0  ;;  %2646 = vmatmul.mubr.msk.bf16.vlgmr.msra.gmra.mrb[20].mxu1 %vm1399_vm2, %v1392_v60  ;;  %v1584_v60 = vsel %vm621_vm4, 16843009, %v2931_v59  ;;  %s2849_s29 = scalar_lea.vmem %s3461_s1, 128  ;;  %p2856_p1 = scmp.lt.s32.totalorder %s3461_s1, %s2854_s0 }
 0x111   : > { %2656 = vmatpush3.bf16.xpose.msra.mxu1 %v1542_v0  ;;  %2657 = vmatprep.mubr.msk.bf16.mxu1 %vm2930_vm0, %v2929_v1  ;;  %v1585_v0 = vunpack.c.0.s8 %v1584_v60  ;;  %p2850_p12 = scmp.ne.s32.totalorder %s3461_s1, %s2849_s29  ;;  %p2857_p2 = scmp.lt.s32.totalorder %s2855_s21, %s2849_s29 }
 0x112   : > { %2667 = vmatprep.subr.bf16.mxu1 %v2929_v1  ;;  %v973_v5 = vpop.f32.mrb[12].mxu0 }
 0x113   : > { %v974_v8 = vadd.f32 %v2403_v2, %v973_v5  ;;  %v2579_v9 = vpop.f32.mrb[13].mxu0  ;;  %vm3309_vm5 = vcmp.ne.s32.totalorder %v1585_v0, 0  ;;  %p2851_p13 = pnand %p2850_p12, %p3068_p4  ;;  %p2858_p3 = por %p2857_p2, %p2856_p1 }
 0x114   : > { %v976_v10 = vpop.f32.mrb[14].mxu0  ;;  %v1277_v11 = vpop.f32.mrb[12].mxu1 }
 0x115   : > { %v1395_v14 = vpack.c.bf16 %v974_v8, %v974_v8  ;;  %v2580_v15 = vpop.f32.mrb[15].mxu0  ;;  %v1278_v16 = vadd.f32 %v2420_v6, %v1277_v11  ;;  %v2619_v17 = vpop.f32.mrb[13].mxu1  ;;  %p2852_p0 = pneg %p2851_p13 }
 0x116   : > { %v1280_v18 = vpop.f32.mrb[14].mxu1 }
 0x117   : > { %v1404_v19 = vsel %vm1399_vm2, %v1395_v14, 0  ;;  %v1642_v20 = vpack.c.bf16 %v1278_v16, %v1278_v16  ;;  %v2620_v21 = vpop.f32.mrb[15].mxu1  ;;  %p2859_p5 = pnand %p2858_p3, %p2852_p0 }
 0x118   : > { %2658 = vmatmul.mubr.msk.bf16.vlgmr.msra.gmra.mrb[24].mxu1 %vm1399_vm2, %v1394_v13  ;;  %2638 = vmatpush3.bf16.xpose.msra.mxu0 %v1404_v19 }
 0x119   : > { %2669 = vmatprep.mubr.msk.bf16.mxu1 %vm2930_vm0, %v2929_v1  ;;  %2649 = vmatprep.subr.bf16.mxu0 %v2929_v1  ;;  %v1696_v24 = vsel %vm1648_vm3, %v1642_v20, 0 }
 0x11a   : > { %v1077_v26 = vpop.f32.mrb[16].mxu0  ;;  %2668 = vmatpush3.bf16.msra.mxu1 %v1696_v24 }
 0x11b   : > { %v1078_v27 = vadd.f32 %v2405_v22, %v1077_v26  ;;  %v2595_v28 = vpop.f32.mrb[17].mxu0  ;;  %2679 = vmatprep.subr.bf16.mxu1 %v2929_v1 }
 0x11c   : > { %v1080_v29 = vpop.f32.mrb[18].mxu0  ;;  %v3296_v37 = vpop.f32.mrb[16].mxu1 }
 0x11d   : > { %v1397_v32 = vpack.c.bf16 %v1078_v27, %v1078_v27  ;;  %v2596_v33 = vpop.f32.mrb[19].mxu0  ;;  %v2635_v38 = vpop.f32.mrb[17].mxu1 }
 0x11e   : > { %v1384_v39 = vpop.f32.mrb[18].mxu1 }
 0x11f   : > { %v1496_v34 = vsel %vm1399_vm2, %v1397_v32, 0  ;;  %2640 = vmatmul.mubr.msk.bf16.vlgmr.msra.gmra.mrb[28].mxu0 %vm1399_vm2, %v1391_v30  ;;  %v2636_v40 = vpop.f32.mrb[19].mxu1 }
 0x120   : > { %2650 = vmatpush3.bf16.xpose.msra.mxu0 %v1496_v34  ;;  %2651 = vmatprep.mubr.msk.bf16.mxu0 %vm2930_vm0, %v2929_v1 }
 0x121   : > { %2661 = vmatprep.subr.bf16.mxu0 %v2929_v1 }
 0x122   : > { %v1225_v42 = vpop.f32.mrb[20].mxu0 }
 0x123   : > { %v1226_v43 = vadd.f32 %v2419_v41, %v1225_v42  ;;  %v2611_v44 = vpop.f32.mrb[21].mxu0 }
 0x124   : > { %v1228_v45 = vpop.f32.mrb[22].mxu0 }
 0x125   : > { %v1641_v46 = vpack.c.bf16 %v1226_v43, %v1226_v43  ;;  %v2612_v47 = vpop.f32.mrb[23].mxu0  ;;  %v2421_v43 = vld [vmem:[%s3514_s7 + $0x2] ss:$0 sm:$0xff] }
 0x127   : > { %2652 = vmatmul.mubr.msk.bf16.vlgmr.msra.gmra.mrb[32].mxu0 %vm1399_vm2, %v1393_v36  ;;  %v1650_v48 = vsel %vm1648_vm3, %v1641_v46, 0  ;;  %v2422_v46 = vld [vmem:[%s3514_s7 + $0x3] ss:$0 sm:$0xff] }
 0x128   : > { %2663 = vmatprep.mubr.msk.bf16.mxu0 %vm2930_vm0, %v2929_v1  ;;  %2662 = vmatpush3.bf16.msra.mxu0 %v1650_v48  ;;  %v1382_v48 = vadd.f32 %v2422_v46, %v3296_v37 }
 0x129   : > { %2673 = vmatprep.subr.bf16.mxu0 %v2929_v1 }
 0x12a   : > { %v3303_v49 = vpop.f32.mrb[24].mxu0 }
 0x12b   : > { %v2627_v50 = vpop.f32.mrb[25].mxu0  ;;  %v1330_v44 = vadd.f32 %v2421_v43, %v3303_v49 }
 0x12c   : > { %v1332_v51 = vpop.f32.mrb[26].mxu0 }
 0x12d   : > { %v2628_v52 = vpop.f32.mrb[27].mxu0  ;;  %v1643_v50 = vpack.c.bf16 %v1330_v44, %v1330_v44 }
 0x12f   : > { %v1742_v56 = vsel %vm1648_vm3, %v1643_v50, 0 }
 0x1e3   : > { %v1486_v53 = vpop.f32.mrb[20].mxu1 }
 0x1e4   : > { %v2647_v54 = vpop.f32.mrb[21].mxu1  ;;  %v1590_v9 = vsel %vm3309_vm5, -inf, %v1486_v53 }
 0x1e5   : > { %v1489_v55 = vpop.f32.mrb[22].mxu1  ;;  %v1596_v11 = vsel %vm1399_vm2, %v1590_v9, -inf }
 0x1e6   : > { %v2648_v57 = vpop.f32.mrb[23].mxu1  ;;  %v1644_v55 = vpack.c.bf16 %v1382_v48, %v1382_v48 }
 0x1e8   : > { %v1788_v59 = vsel %vm1648_vm3, %v1644_v55, 0 }
 0x1eb   : > { %v1578_v58 = vpop.f32.mrb[24].mxu1 }
 0x1ec   : > { %v2659_v61 = vpop.f32.mrb[25].mxu1  ;;  %v1592_v17 = vsel %vm3309_vm5, -inf, %v1578_v58  ;;  %v1834_v58 = vld [vmem:[%s3515_s8] sm:$0xf] }
 0x1ed   : > { %v1581_v62 = vpop.f32.mrb[26].mxu1  ;;  %v1602_v19 = vsel %vm1399_vm2, %v1592_v17, -inf }
 0x1ee   : > { %v2660_v63 = vpop.f32.mrb[27].mxu1  ;;  %v1842_v62 = vsel %vm1648_vm3, %v1834_v58, 0 }
 0x1f2   : > { %v1440_v3 = vpop.f32.mrb[28].mxu0 }
 0x1f3   : > { %v1589_v4 = vsel %vm3309_vm5, -inf, %v1440_v3  ;;  %v2641_v5 = vpop.f32.mrb[29].mxu0  ;;  %v1835_v3 = vld [vmem:[%s3515_s8 + $0x4] sm:$0xf] }
 0x1f4   : > { %v1443_v6 = vpop.f32.mrb[30].mxu0  ;;  %v1593_v8 = vsel %vm1399_vm2, %v1589_v4, -inf  ;;  %v1836_v5 = vld [vmem:[%s3515_s8 + $0x8] sm:$0xf] }
 0x1f5   : > { %1594 = vmax.xlane.f32.xlu0 %v1593_v8  ;;  %v2642_v10 = vpop.f32.mrb[31].mxu0 }
 0x1f6   : > { %v1934_v10 = vsel %vm1648_vm3, %v1836_v5, 0  ;;  %v2826_v5 = vld [vmem:[%s3521_s14 + $0x28] sm:$0xff]  }
 0x1f9   : > { %1597 = vmax.xlane.f32.xlu0 %v1596_v11 }
 0x1fa   : > { %v1532_v12 = vpop.f32.mrb[32].mxu0 }
 0x1fb   : > { %v1591_v13 = vsel %vm3309_vm5, -inf, %v1532_v12  ;;  %v2653_v14 = vpop.f32.mrb[33].mxu0  ;;  %v1837_v12 = vld [vmem:[%s3515_s8 + $0xc] sm:$0xf] }
 0x1fc   : > { %v1535_v15 = vpop.f32.mrb[34].mxu0  ;;  %v1599_v16 = vsel %vm1399_vm2, %v1591_v13, -inf }
 0x1fd   : > { %1600 = vmax.xlane.f32.xlu1 %v1599_v16  ;;  %v2654_v18 = vpop.f32.mrb[35].mxu0 }
 0x201   : > { %1603 = vmax.xlane.f32.xlu1 %v1602_v19 }
 0x282   : > { %v1595_v20 = vpop.xlane.xlu0 %1594 }
 0x283   : > { %v1605_v21 = vsub.f32 %v1589_v4, %v1595_v20  ;;  %v1888_v4 = vsel %vm1648_vm3, %v1835_v3, 0  ;;  %v2824_v3 = vld [vmem:[%s3521_s14 + $0x18] sm:$0xff]  }
 0x285   : > { %v1609_v22 = vmul.f32 1.442695, %v1605_v21 }
 0x286   : > { %v1598_v23 = vpop.xlane.xlu0 %1597 }
 0x287   : > { %2829 = vpow2.f32 %v1609_v22  ;;  %v1606_v24 = vsub.f32 %v1590_v9, %v1598_v23 }
 0x289   : > { %v1611_v25 = vmul.f32 1.442695, %v1606_v24 }
 0x28a   : > { %v1601_v26 = vpop.xlane.xlu1 %1600 }
 0x28b   : > { %2831 = vpow2.f32 %v1611_v25  ;;  %v1607_v27 = vsub.f32 %v1591_v13, %v1601_v26 }
 0x28d   : > { %v1613_v28 = vmul.f32 1.442695, %v1607_v27 }
 0x28e   : > { %v1604_v29 = vpop.xlane.xlu1 %1603 }
 0x28f   : > { %2833 = vpow2.f32 %v1613_v28  ;;  %v1608_v30 = vsub.f32 %v1592_v17, %v1604_v29  ;;  %v1980_v17 = vsel %vm1648_vm3, %v1837_v12, 0 }
 0x291   : > { %v2830_v31 = vpop.eup %2829  ;;  %v1615_v32 = vmul.f32 1.442695, %v1608_v30 }
 0x292   : > { %v1617_v33 = vsel %vm1399_vm2, %v2830_v31, 0.0 }
 0x293   : > { %2835 = vpow2.f32 %v1615_v32  ;;  %1618 = vadd.xlane.f32.xlu0 %v1617_v33 }
 0x295   : > { %v2832_v34 = vpop.eup %2831 }
 0x296   : > { %v1620_v35 = vsel %vm1399_vm2, %v2832_v34, 0.0 }
 0x297   : > { %1621 = vadd.xlane.f32.xlu1 %v1620_v35 }
 0x299   : > { %v2834_v36 = vpop.eup %2833 }
 0x29a   : > { %v1623_v38 = vsel %vm1399_vm2, %v2834_v36, 0.0 }
 0x29b   : > { %1624 = vadd.xlane.f32.xlu0 %v1623_v38 }
 0x29d   : > { %v2836_v39 = vpop.eup %2835 }
 0x29e   : > { %v1626_v40 = vsel %vm1399_vm2, %v2836_v39, 0.0 }
 0x29f   : > { %1627 = vadd.xlane.f32.xlu1 %v1626_v40 }
 0x320   : > { %v1619_v41 = vpop.xlane.xlu0 %1618 }
 0x321   : > { %2837 = vrcp.f32 %v1619_v41 }
 0x324   : > { %v1622_v42 = vpop.xlane.xlu1 %1621 }
 0x325   : > { %2839 = vrcp.f32 %v1622_v42 }
 0x328   : > { %v1625_v45 = vpop.xlane.xlu0 %1624 }
 0x329   : > { %2841 = vrcp.f32 %v1625_v45 }
 0x32b   : > { %v2838_v47 = vpop.eup %2837 }
 0x32c   : > { %v1633_v51 = vmul.f32 %v2838_v47, %v2830_v31  ;;  %v1628_v52 = vpop.xlane.xlu1 %1627 }
 0x32d   : > { %2843 = vrcp.f32 %v1628_v52 }
 0x32e   : > { %v1637_v53 = vpack.c.bf16 %v1633_v51, %v1633_v51  ;;  %v2447_v51 = vld [vmem:[%s3516_s9] ss:$0 sm:$0xff] }
 0x32f   : > { %v2840_v54 = vpop.eup %2839 }
 0x330   : > { %v1634_v57 = vmul.f32 %v2840_v54, %v2832_v34  ;;  %2664 = vmatmul.mubr.msk.bf16.vlgmr.msra.gmra.mrb[36].mxu0 %vm1399_vm2, %v1637_v53 }
 0x331   : > { %2674 = vmatpush3.bf16.msra.mxu0 %v1742_v56  ;;  %2675 = vmatprep.mubr.msk.bf16.mxu0 %vm2930_vm0, %v2929_v1 }
 0x332   : > { %v1638_v49 = vpack.c.bf16 %v1634_v57, %v1634_v57  ;;  %2685 = vmatprep.subr.bf16.mxu0 %v2929_v1 }
 0x333   : > { %v2842_v37 = vpop.eup %2841 }
 0x334   : > { %v1635_v60 = vmul.f32 %v2842_v37, %v2834_v36  ;;  %2670 = vmatmul.mubr.msk.bf16.vlgmr.msra.gmra.mrb[28].mxu1 %vm1399_vm2, %v1638_v49 }
 0x335   : > { %2680 = vmatpush3.bf16.msra.mxu1 %v1788_v59  ;;  %2681 = vmatprep.mubr.msk.bf16.mxu1 %vm2930_vm0, %v2929_v1 }
 0x336   : > { %v1639_v61 = vpack.c.bf16 %v1635_v60, %v1635_v60  ;;  %2691 = vmatprep.subr.bf16.mxu1 %v2929_v1 }
 0x337   : > { %v2844_v63 = vpop.eup %2843 }
 0x338   : > { %v1636_v0 = vmul.f32 %v2844_v63, %v2836_v39  ;;  %2676 = vmatmul.mubr.msk.bf16.vlgmr.msra.gmra.mrb[40].mxu0 %vm1399_vm2, %v1639_v61  ;;  %v2820_v63 = vld [vmem:[%s3519_s12 + $0x8] sm:$0xff]  }
 0x339   : > { %2686 = vmatpush3.bf16.msra.mxu0 %v1842_v62  ;;  %2687 = vmatprep.mubr.msk.bf16.mxu0 %vm2930_vm0, %v2929_v1  ;;  %v2819_v62 = vld [vmem:[%s3519_s12] sm:$0xff]  }
 0x33a   : > { %v1640_v2 = vpack.c.bf16 %v1636_v0, %v1636_v0  ;;  %2697 = vmatprep.subr.bf16.mxu0 %v2929_v1  ;;  %v2822_v0 = vld [vmem:[%s3521_s14 + $0x8] sm:$0xff]  }
 0x33c   : > { %2682 = vmatmul.mubr.msk.bf16.vlgmr.msra.gmra.mrb[32].mxu1 %vm1399_vm2, %v1640_v2  ;;  %v2823_v2 = vld [vmem:[%s3521_s14 + $0x10] sm:$0xff]  }
 0x33d   : > { %2693 = vmatprep.mubr.msk.bf16.mxu1 %vm2930_vm0, %v2929_v1  ;;  %2692 = vmatpush3.bf16.msra.mxu1 %v1888_v4  ;;  %v2825_v4 = vld [vmem:[%s3521_s14 + $0x20] sm:$0xff]  }
 0x33e   : > { %2703 = vmatprep.subr.bf16.mxu1 %v2929_v1 }
 0x403   : > { %v1686_v6 = vpop.f32.mrb[36].mxu0 }
 0x404   : > { %v1830_v8 = vpack.c.bf16 %v1686_v6, %v1686_v6  ;;  %v2665_v9 = vpop.f32.mrb[37].mxu0 }
 0x405   : > { %v1689_v11 = vpop.f32.mrb[38].mxu0 }
 0x406   : > { %v2666_v13 = vpop.f32.mrb[39].mxu0  ;;  %2688 = vmatmul.mubr.msk.bf16.vlgmr.msra.gmra.mrb[44].mxu0 %vm1399_vm2, %v1830_v8  ;;  %v2448_v11 = vld [vmem:[%s3517_s10] ss:$0 sm:$0xff] }
 0x407   : > { %v1732_v14 = vpop.f32.mrb[28].mxu1  ;;  %2698 = vmatpush3.bf16.msra.mxu0 %v1934_v10  ;;  %2699 = vmatprep.mubr.msk.bf16.mxu0 %vm2930_vm0, %v2929_v1  ;;  %v2449_v13 = vld [vmem:[%s3518_s11] ss:$0 sm:$0xff] }
 0x408   : > { %v1831_v15 = vpack.c.bf16 %v1732_v14, %v1732_v14  ;;  %v2671_v16 = vpop.f32.mrb[29].mxu1  ;;  %2709 = vmatprep.subr.bf16.mxu0 %v2929_v1 }
 0x409   : > { %v1735_v18 = vpop.f32.mrb[30].mxu1 }
 0x40a   : > { %v2672_v19 = vpop.f32.mrb[31].mxu1  ;;  %2694 = vmatmul.mubr.msk.bf16.vlgmr.msra.gmra.mrb[36].mxu1 %vm1399_vm2, %v1831_v15  ;;  %v2828_v18 = vld [vmem:[%s3521_s14 + $0x38] sm:$0xff]  }
 0x40b   : > { %v1778_v20 = vpop.f32.mrb[40].mxu0  ;;  %2704 = vmatpush3.bf16.msra.mxu1 %v1980_v17  ;;  %2705 = vmatprep.mubr.msk.bf16.mxu1 %vm2930_vm0, %v2929_v1  ;;  %v2827_v17 = vld [vmem:[%s3521_s14 + $0x30] sm:$0xff]   ;;  %v2450_v19 = vld [vmem:[%s3520_s13] ss:$0 sm:$0xff] }
 0x40c   : > { %v1832_v21 = vpack.c.bf16 %v1778_v20, %v1778_v20  ;;  %v2677_v22 = vpop.f32.mrb[41].mxu0  ;;  %2717 = vmatprep.subr.bf16.mxu1 %v2929_v1 }
 0x40d   : > { %v1781_v23 = vpop.f32.mrb[42].mxu0 }
 0x40e   : > { %v2678_v24 = vpop.f32.mrb[43].mxu0  ;;  %2700 = vmatmul.mubr.msk.bf16.vlgmr.msra.gmra.mrb[48].mxu0 %vm1399_vm2, %v1832_v21 }
 0x40f   : > { %v1824_v25 = vpop.f32.mrb[32].mxu1  ;;  %2713 = vmatprep.mubr.msk.bf16.mxu0 %vm2930_vm0, %v2929_v1  ;;  %2710 = vmatpush3.bf16.msra.mxu0 %v2819_v62 }
 0x410   : > { %v1833_v26 = vpack.c.bf16 %v1824_v25, %v1824_v25  ;;  %v2683_v27 = vpop.f32.mrb[33].mxu1  ;;  %2711 = vmatprep.subr.bf16.mxu0 %v2929_v1 }
 0x411   : > { %v1827_v28 = vpop.f32.mrb[34].mxu1 }
 0x412   : > { %v2684_v29 = vpop.f32.mrb[35].mxu1  ;;  %2706 = vmatmul.mubr.msk.bf16.vlgmr.msra.gmra.mrb[40].mxu1 %vm1399_vm2, %v1833_v26 }
 0x413   : > { %2733 = vmatprep.mubr.msk.bf16.mxu1 %vm2930_vm0, %v2929_v1  ;;  %2712 = vmatpush3.bf16.msra.mxu0 %v2820_v63 }
 0x4d9   : > { %v1878_v30 = vpop.f32.mrb[44].mxu0 }
 0x4da   : > { %v2689_v31 = vpop.f32.mrb[45].mxu0  ;;  %v2022_v35 = vsel %vm680_vm1, %v1878_v30, 0.0 }
 0x4db   : > { %v1881_v32 = vpop.f32.mrb[46].mxu0 }
 0x4dc   : > { %v2690_v33 = vpop.f32.mrb[47].mxu0 }
 0x4dd   : > { %v1924_v34 = vpop.f32.mrb[36].mxu1 }
 0x4de   : > { %v2023_v36 = vsel %vm680_vm1, %v1924_v34, 0.0  ;;  %v2695_v38 = vpop.f32.mrb[37].mxu1 }
 0x4df   : > { %v2024_v39 = vadd.f32 %v2023_v36, %v2022_v35  ;;  %v1927_v40 = vpop.f32.mrb[38].mxu1 }
 0x4e0   : > { %v2696_v41 = vpop.f32.mrb[39].mxu1 }
 0x4e1   : > { %v1970_v42 = vpop.f32.mrb[48].mxu0 }
 0x4e2   : > { %v2025_v43 = vsel %vm680_vm1, %v1970_v42, 0.0  ;;  %v2701_v44 = vpop.f32.mrb[49].mxu0 }
 0x4e3   : > { %v2026_v45 = vadd.f32 %v2025_v43, %v2024_v39  ;;  %v1973_v46 = vpop.f32.mrb[50].mxu0  ;;  %v2463_v44 = vld [vmem:[%s3523_s16] ss:$0 sm:$0xff] }
 0x4e4   : > { %v2702_v47 = vpop.f32.mrb[51].mxu0  ;;  %v2464_v46 = vld [vmem:[%s3524_s17] ss:$0 sm:$0xff] }
 0x4e5   : > { %v2016_v48 = vpop.f32.mrb[40].mxu1 }
 0x4e6   : > { %v2027_v50 = vsel %vm680_vm1, %v2016_v48, 0.0  ;;  %v2707_v52 = vpop.f32.mrb[41].mxu1 }
 0x4e7   : > { %v2028_v53 = vadd.f32 %v2027_v50, %v2026_v45  ;;  %v2019_v54 = vpop.f32.mrb[42].mxu1 }
 0x4e8   : > { %v2708_v55 = vpop.f32.mrb[43].mxu1 }
 0x4e9   : > { %v2036_v56 = vadd.f32 %v2447_v51, %v2028_v53 }
 0x4eb   : > { %v2037_v57 = vadd.f32 %v2036_v56, %v3118_v7  ;;  %v2821_v7 = vld [vmem:[%s3521_s14] sm:$0xff]  }
 0x4ec   : > { %2718 = vmatpush3.bf16.msra.mxu1 %v2821_v7 }
 0x4ed   : > { %v2038_v49 = vsel %vm680_vm1, %v2037_v57, 0.0  ;;  %2719 = vmatprep.subr.bf16.mxu1 %v2929_v1 }
 0x4ee   : > { %2039 = vadd.xlane.f32.xlu0 %v2038_v49 }
 0x4f0   : > { %2720 = vmatpush3.bf16.msra.mxu1 %v2822_v0 }
 0x4f1   : > { %2721 = vmatprep.subr.bf16.mxu1 %v2929_v1 }
 0x4f4   : > { %2722 = vmatpush3.bf16.msra.mxu1 %v2823_v2 }
 0x4f5   : > { %2723 = vmatprep.subr.bf16.mxu1 %v2929_v1 }
 0x4f8   : > { %2724 = vmatpush3.bf16.msra.mxu1 %v2824_v3 }
 0x4f9   : > { %2725 = vmatprep.subr.bf16.mxu1 %v2929_v1 }
 0x4fc   : > { %2726 = vmatpush3.bf16.msra.mxu1 %v2825_v4 }
 0x4fd   : > { %2727 = vmatprep.subr.bf16.mxu1 %v2929_v1 }
 0x500   : > { %2728 = vmatpush3.bf16.msra.mxu1 %v2826_v5 }
 0x501   : > { %2729 = vmatprep.subr.bf16.mxu1 %v2929_v1 }
 0x504   : > { %2730 = vmatpush3.bf16.msra.mxu1 %v2827_v17 }
 0x505   : > { %2731 = vmatprep.subr.bf16.mxu1 %v2929_v1  ;;  %v2454_v1 = vld [vmem:[%s3522_s15] ss:$0 sm:$0xff] }
 0x508   : > { %2732 = vmatpush3.bf16.msra.mxu1 %v2828_v18 }
 0x57b   : > { %v2040_v37 = vpop.xlane.xlu0 %2039 }
 0x57c   : > { %v2042_v58 = vmul.f32 0.03125, %v2040_v37 }
 0x57e   : > { %v2043_v59 = vsub.f32 %v2037_v57, %v2042_v58 }
 0x580   : > { %v2044_v60 = vmul.f32 %v2043_v59, %v2043_v59 }
 0x582   : > { %v2045_v61 = vsel %vm680_vm1, %v2044_v60, 0.0 }
 0x583   : > { %2046 = vadd.xlane.f32.xlu1 %v2045_v61 }
 0x610   : > { %v2047_v6 = vpop.xlane.xlu1 %2046 }
 0x611   : > { %v2048_v8 = vmul.f32 0.03125, %v2047_v6 }
 0x613   : > { %v2049_v9 = vadd.f32 1e-05, %v2048_v8 }
 0x615   : > { %2845 = vrsqrt.f32 %v2049_v9 }
 0x61f   : > { %v2846_v10 = vpop.eup %2845 }
 0x620   : > { %v2051_v12 = vmul.f32 %v2846_v10, %v2043_v59 }
 0x622   : > { %v2059_v14 = vmul.f32 %v2448_v11, %v2051_v12 }
 0x624   : > { %v2067_v15 = vadd.f32 %v2449_v13, %v2059_v14 }
 0x626   : > { %v2068_v16 = vpack.c.bf16 %v2067_v15, %v2067_v15 }
 0x628   : > { %2714 = vmatmul.mubr.msk.bf16.vlgmr.msra.gmra.mrb[52].mxu0 %vm680_vm1, %v2068_v16 }
 0x6fb   : > { %v2129_v20 = vpop.f32.mrb[52].mxu0 }
 0x6fc   : > { %v2130_v21 = vadd.f32 %v2450_v19, %v2129_v20  ;;  %v2715_v22 = vpop.f32.mrb[53].mxu0 }
 0x6fd   : > { %v2132_v23 = vpop.f32.mrb[54].mxu0 }
 0x6fe   : > { %v2135_v24 = vmax.f32 %v2130_v21, 0.0  ;;  %v2716_v25 = vpop.f32.mrb[55].mxu0 }
 0x700   : > { %v2136_v26 = vpack.c.bf16 %v2135_v24, %v2135_v24 }
 0x702   : > { %2734 = vmatmul.mubr.bf16.vlgmr.msra.gmra.mrb[44].mxu1 %v2136_v26 }
 0x7d5   : > { %v2242_v27 = vpop.f32.mrb[44].mxu1 }
 0x7d6   : > { %v2243_v28 = vadd.f32 %v2454_v1, %v2242_v27  ;;  %v2735_v29 = vpop.f32.mrb[45].mxu1 }
 0x7d7   : > { %v2245_v30 = vpop.f32.mrb[46].mxu1 }
 0x7d8   : > { %v2736_v31 = vpop.f32.mrb[47].mxu1  ;;  %v2248_v32 = vadd.f32 %v2243_v28, %v2067_v15 }
 0x7da   : > { %v2249_v33 = vsel %vm680_vm1, %v2248_v32, 0.0 }
 0x7db   : > { %2250 = vadd.xlane.f32.xlu0 %v2249_v33 }
 0x868   : > { %v2251_v34 = vpop.xlane.xlu0 %2250 }
 0x869   : > { %v2252_v35 = vmul.f32 0.03125, %v2251_v34 }
 0x86b   : > { %v2253_v36 = vsub.f32 %v2248_v32, %v2252_v35 }
 0x86d   : > { %v2254_v38 = vmul.f32 %v2253_v36, %v2253_v36 }
 0x86f   : > { %v2255_v39 = vsel %vm680_vm1, %v2254_v38, 0.0 }
 0x870   : > { %2256 = vadd.xlane.f32.xlu1 %v2255_v39 }
 0x8fd   : > { %v2257_v40 = vpop.xlane.xlu1 %2256 }
 0x8fe   : > { %v2258_v41 = vmul.f32 0.03125, %v2257_v40 }
 0x900   : > { %v2259_v42 = vadd.f32 1e-05, %v2258_v41 }
 0x902   : > { %2847 = vrsqrt.f32 %v2259_v42 }
 0x90c   : > { %v2848_v43 = vpop.eup %2847 }
 0x90d   : > { %v2261_v45 = vmul.f32 %v2848_v43, %v2253_v36 }
 0x90f   : > { %v2269_v47 = vmul.f32 %v2463_v44, %v2261_v45 }
 0x911   : > { %v2277_v48 = vadd.f32 %v2464_v46, %v2269_v47 }
 0x913   : > { %2278 = vst.msk [vmem:[%s601_s22] sm:$0xff] %vm680_vm1, %v2277_v48 }
 0x914   : > { %2862 = shalt.err (!%p2859_p5)
}
 0x915   : > { %s2863_s3 = scalar_lea.hbm %s3459_s5, 128  ;;  %s2867_s23 = scalar_lea.hbm %s3555_s4, 256 }
 0x916   : > { %p2864_p6 = scmp.ne.s32.totalorder %s3459_s5, %s2863_s3  ;;  %p2868_p10 = scmp.lt.u32.totalorder %s3459_s5, %s3555_s4 }
 0x917   : > { %p2869_p11 = scmp.lt.u32.totalorder %s2867_s23, %s2863_s3  ;;  %p2871_p13 = scmp.lt.u32.totalorder %s2863_s3, %s3459_s5 }
 0x918   : > { %p2865_p7 = pnand %p2864_p6, %p3068_p4 }
 0x919   : > { %p2870_p12 = por %p2869_p11, %p2868_p10 }
 0x91a   : > { %p2866_p9 = pneg %p2865_p7 }
 0x91b   : > { %p2872_p0 = por %p2871_p13, %p2870_p12 }
 0x91d   : > { %p2873_p1 = pnand %p2872_p0, %p2866_p9 }
 0x91f   : > { %2876 = shalt.err (!%p2873_p1)
}
 0x920   : > { %2737 = dma.vmem_to_hbm [thread:$0]  (%p3068_p4), %s3461_s1, 128, %s3459_s5, %s2280_s25  }
 0x921 PF: > { %s3556_s29 = sld [smem:[#allocation5_spill]]  ;;  %p2743_p2 = scmp.ge.s32.totalorder %s2927_s19, 2 }
 0x923   : > { %p2740_p3 = pnand %p2743_p2, %p3075_p8 }
 0x927   : > { %s2306_s30 = sand.u32 1, %s3556_s29  }
 0x928   : > { %s2307_s0 = scalar_lea.sflag [#allocation3], %s2306_s30 }
 0x929   : > { %2902 = dma.done.wait (!%p2740_p3), %s2307_s0, 128  }
 0x92a   : > { %2904 = vsyncadd (!%p2740_p3), %s2307_s0, 4294967168  ;;  %s31_s19 = sadd.s32 1, %s2927_s19   ;;  %s3557_s21 = sld [smem:[#allocation6_spill]] }
 0x92b   : > { %p28_p5 = scmp.ge.s32.totalorder %s31_s19, 4   ;;  %s3558_s29 = sld [smem:[#allocation9_spill]] }
 0x92c   : > { %s3559_s30 = sld [smem:[#allocation7_spill]]  ;;  %s3560_s0 = sld [smem:[#allocation8_spill]] }
 0x92d   : > { %s3561_s27 = smov %s2911_s28  ;;  %30 = sbr.rel (!%p28_p5) target bundleno = 12 (0xc), region = 131 }
 0x930   : > { %s3562_s28 = smov %s3557_s21 }
 0x934   :  { %2312 = vsyncpa [#allocation3], 1 }
 0x935   :  { %2314 = vsyncpa [#allocation3 + $0x1], 1 }

</bundles_post_ra>
